<compile_context>
chip_gen: v7x
topology: tpu7x:2x2x1
jax: 0.10.0
libtpu: 0.0.40
codegen_flags: <defaults>
</compile_context>

<pallas_src>
import jax
import jax.numpy as jnp
from jax import lax
from jax.experimental import pallas as pl
from jax.experimental.pallas import tpu as pltpu

# Network dims (fixed by the PyTorch module).
D_IN, H, D_OUT = 4, 12, 1

# Flat parameter layout -- identical to torch named_parameters() flattening
# order used by Net.set_parameter / Net.get_parameter:
#   [  0: 48)  layers.0.weight (12, 4)  row-major
#   [ 48: 60)  layers.0.bias   (12,)
#   [ 60:204)  layers.2.weight (12, 12) row-major
#   [204:216)  layers.2.bias   (12,)
#   [216:228)  layers.4.weight (1, 12)
#   [228:229)  layers.4.bias   (1,)
W1_OFF, B1_OFF = 0, 48
W2_OFF, B2_OFF = 60, 204
W3_OFF, B3_OFF = 216, 228
DOF = 229

LANES = 128          # vreg lane width
CHUNK_ROWS = 8       # (8, 128) f32 == exactly one vreg per feature/neuron slab


def _round_up(n: int, m: int) -> int:
    return ((n + m - 1) // m) * m


def mlp_kernel(p_ref, x_ref, o_ref):
    """p_ref: (229,) f32 in SMEM (all weights/biases, scalar-addressed).
    x_ref: (4, SR, 128) f32 VMEM -- per-feature (rows x lanes) batch slabs.
    o_ref: (SR, 128) f32 VMEM."""
    sr = x_ref.shape[1]

    # Hoist all 229 scalar parameter reads out of the chunk loop (loop-invariant).
    w1 = [[p_ref[W1_OFF + D_IN * k + j] for j in range(D_IN)] for k in range(H)]
    b1 = [p_ref[B1_OFF + k] for k in range(H)]
    w2 = [[p_ref[W2_OFF + H * k + j] for j in range(H)] for k in range(H)]
    b2 = [p_ref[B2_OFF + k] for k in range(H)]
    w3 = [p_ref[W3_OFF + j] for j in range(H)]
    b3 = p_ref[B3_OFF]

    def chunk(c, carry):
        r0 = pl.multiple_of(c * CHUNK_ROWS, CHUNK_ROWS)
        # Four (8,128) input slabs -- one full vreg each.
        xs = [x_ref[j, pl.ds(r0, CHUNK_ROWS), :] for j in range(D_IN)]

        # Layer 1: Linear(4,12) + tanh.  Unrolled scalar*slab MACs on the VPU,
        # bias as accumulator init; tanh goes to the EUP (native op).
        h1 = []
        for k in range(H):
            acc = xs[0] * w1[k][0] + b1[k]
            for j in range(1, D_IN):
                acc = acc + xs[j] * w1[k][j]
            h1.append(jnp.tanh(acc))

        # Layer 2: Linear(12,12) + tanh (the hot 144-MAC part, all in vregs).
        h2 = []
        for k in range(H):
            acc = h1[0] * w2[k][0] + b2[k]
            for j in range(1, H):
                acc = acc + h1[j] * w2[k][j]
            h2.append(jnp.tanh(acc))

        # Layer 3: Linear(12,1) -> lane-dense (8,128) output slab.
        out = h2[0] * w3[0] + b3
        for j in range(1, H):
            out = out + h2[j] * w3[j]
        o_ref[pl.ds(r0, CHUNK_ROWS), :] = out
        return carry

    lax.fori_loop(0, sr // CHUNK_ROWS, chunk, 0)


def _pallas_mlp(x_slabs, flat_params, rows_per_step):
    """x_slabs: (4, R, 128) f32 feature-major batch slabs (R multiple of 8).
    Returns (R, 128) f32 predictions in the same row/lane layout."""
    _, R, _ = x_slabs.shape
    # Large tiles amortize the ~0.35us/step overhead; keep >=4 grid steps when
    # the batch is big enough (v7x has two TensorCores sharing the grid).
    sr = min(rows_per_step, max(CHUNK_ROWS, _round_up(pl.cdiv(R, 4), CHUNK_ROWS)))
    grid = (pl.cdiv(R, sr),)
    return pl.pallas_call(
        mlp_kernel,
        out_shape=jax.ShapeDtypeStruct((R, LANES), jnp.float32),
        grid=grid,
        in_specs=[
            # All 229 weights/biases as scalars in SMEM (no padded VMEM weight
            # tiles, no per-step lane broadcasts of (12,1) biases).
            pl.BlockSpec(memory_space=pltpu.MemorySpace.SMEM),
            # Input slabs stream through the double-buffered pipeline.
            pl.BlockSpec((D_IN, sr, LANES), lambda i: (0, i, 0)),
        ],
        out_specs=pl.BlockSpec((sr, LANES), lambda i: (i, 0)),
        compiler_params=pltpu.CompilerParams(
            dimension_semantics=("parallel",),
        ),
    )(flat_params, x_slabs)


def net_forward(x, flat_params, rows_per_step: int = 512):
    """x: (B, 4) f32 (PyTorch layout). flat_params: (229,) f32 in
    Net.set_parameter order. Returns (B, 1) f32 == Net.forward(x)."""
    B = x.shape[0]
    assert x.shape == (B, D_IN)
    assert flat_params.shape == (DOF,)

    B_pad = _round_up(B, CHUNK_ROWS * LANES)   # multiple of 1024
    R = B_pad // LANES

    # Glue (one fused XLA copy): optional tail pad + batch-major -> feature-major
    # slab layout.  Callers that already hold x as (4, R, 128) slabs should call
    # _pallas_mlp directly and skip this copy entirely.
    if B_pad != B:
        x = jnp.pad(x, ((0, B_pad - B), (0, 0)))
    x_slabs = jnp.transpose(x.reshape(R, LANES, D_IN), (2, 0, 1))

    out = _pallas_mlp(x_slabs, flat_params, rows_per_step)
    out = out.reshape(B_pad, 1)                # free (row-major reshape)
    return out if B_pad == B else out[:B]


def init_flat_params(key):
    """PyTorch nn.Linear default init (uniform +-1/sqrt(fan_in)), flattened in
    named_parameters() order -- exactly what Net.set_parameter consumes."""
    ks = jax.random.split(key, 6)

    def u(k, shape, fan_in):
        bound = 1.0 / (fan_in ** 0.5)
        return jax.random.uniform(k, shape, jnp.float32, -bound, bound)

    parts = [
        u(ks[0], (H, D_IN), D_IN),   # layers.0.weight
        u(ks[1], (H,), D_IN),        # layers.0.bias
        u(ks[2], (H, H), H),         # layers.2.weight
        u(ks[3], (H,), H),           # layers.2.bias
        u(ks[4], (D_OUT, H), H),     # layers.4.weight
        u(ks[5], (D_OUT,), H),       # layers.4.bias
    ]
    return jnp.concatenate([p.reshape(-1) for p in parts])


def net_forward_ref(x, flat_params):
    w1 = flat_params[W1_OFF:B1_OFF].reshape(H, D_IN)
    b1 = flat_params[B1_OFF:W2_OFF]
    w2 = flat_params[W2_OFF:B2_OFF].reshape(H, H)
    b2 = flat_params[B2_OFF:W3_OFF]
    w3 = flat_params[W3_OFF:B3_OFF].reshape(D_OUT, H)
    b3 = flat_params[B3_OFF:DOF]
    h1 = jnp.tanh(x @ w1.T + b1)
    h2 = jnp.tanh(h1 @ w2.T + b2)
    return h2 @ w3.T + b3


if __name__ == "__main__":
    key = jax.random.PRNGKey(0)
    pkey, k1, k2 = jax.random.split(key, 3)
    flat_params = init_flat_params(pkey)

    # Case 1: tiny batch (B=8) -> single grid step, heavy tail padding.
    x1 = jax.random.normal(k1, (8, D_IN), jnp.float32)
    y1 = jax.block_until_ready(net_forward(x1, flat_params))
    r1 = net_forward_ref(x1, flat_params)
    assert y1.shape == (8, 1)
    assert jnp.allclose(y1, r1, atol=1e-5, rtol=1e-5)

    # Case 2: B=9000 -> pad to 9216 (R=72), SR=24 -> 3 grid steps, each with
    # 3 inner (8,128) chunks (exercises multi-step grid, the in-kernel chunk
    # loop, and the pad/trim path).
    x2 = jax.random.normal(k2, (9000, D_IN), jnp.float32)
    y2 = jax.block_until_ready(net_forward(x2, flat_params))
    r2 = net_forward_ref(x2, flat_params)
    assert y2.shape == (9000, 1)
    assert jnp.allclose(y2, r2, atol=1e-5, rtol=1e-5)

    print("KERNEL_OK")
</pallas_src>

<mosaic_0001>
module attributes {stable_mosaic.version = 11 : i64} {
  func.func @mlp_kernel(%arg0: i32, %arg1: memref<229xf32, #tpu.memory_space<smem>>, %arg2: memref<4x8x128xf32, #tpu.memory_space<vmem>>, %arg3: memref<8x128xf32, #tpu.memory_space<vmem>>) attributes {dimension_semantics = [#tpu.dimension_semantics<parallel>], iteration_bounds = array<i64: 1>, scalar_prefetch = 0 : i64, scratch_operands = 0 : i64, tpu.core_type = #tpu.core_type<tc>, window_params = [{transform_indices = @transform_0, window_bounds = array<i64: 229>}, {transform_indices = @transform_1, window_bounds = array<i64: 4, 8, 128>}, {transform_indices = @transform_2, window_bounds = array<i64: 8, 128>}]} {
    %c0 = arith.constant 0 : index
    %0 = memref.load %arg1[%c0] : memref<229xf32, #tpu.memory_space<smem>>
    %c1 = arith.constant 1 : index
    %1 = memref.load %arg1[%c1] : memref<229xf32, #tpu.memory_space<smem>>
    %c2 = arith.constant 2 : index
    %2 = memref.load %arg1[%c2] : memref<229xf32, #tpu.memory_space<smem>>
    %c3 = arith.constant 3 : index
    %3 = memref.load %arg1[%c3] : memref<229xf32, #tpu.memory_space<smem>>
    %c4 = arith.constant 4 : index
    %4 = memref.load %arg1[%c4] : memref<229xf32, #tpu.memory_space<smem>>
    %c5 = arith.constant 5 : index
    %5 = memref.load %arg1[%c5] : memref<229xf32, #tpu.memory_space<smem>>
    %c6 = arith.constant 6 : index
    %6 = memref.load %arg1[%c6] : memref<229xf32, #tpu.memory_space<smem>>
    %c7 = arith.constant 7 : index
    %7 = memref.load %arg1[%c7] : memref<229xf32, #tpu.memory_space<smem>>
    %c8 = arith.constant 8 : index
    %8 = memref.load %arg1[%c8] : memref<229xf32, #tpu.memory_space<smem>>
    %c9 = arith.constant 9 : index
    %9 = memref.load %arg1[%c9] : memref<229xf32, #tpu.memory_space<smem>>
    %c10 = arith.constant 10 : index
    %10 = memref.load %arg1[%c10] : memref<229xf32, #tpu.memory_space<smem>>
    %c11 = arith.constant 11 : index
    %11 = memref.load %arg1[%c11] : memref<229xf32, #tpu.memory_space<smem>>
    %c12 = arith.constant 12 : index
    %12 = memref.load %arg1[%c12] : memref<229xf32, #tpu.memory_space<smem>>
    %c13 = arith.constant 13 : index
    %13 = memref.load %arg1[%c13] : memref<229xf32, #tpu.memory_space<smem>>
    %c14 = arith.constant 14 : index
    %14 = memref.load %arg1[%c14] : memref<229xf32, #tpu.memory_space<smem>>
    %c15 = arith.constant 15 : index
    %15 = memref.load %arg1[%c15] : memref<229xf32, #tpu.memory_space<smem>>
    %c16 = arith.constant 16 : index
    %16 = memref.load %arg1[%c16] : memref<229xf32, #tpu.memory_space<smem>>
    %c17 = arith.constant 17 : index
    %17 = memref.load %arg1[%c17] : memref<229xf32, #tpu.memory_space<smem>>
    %c18 = arith.constant 18 : index
    %18 = memref.load %arg1[%c18] : memref<229xf32, #tpu.memory_space<smem>>
    %c19 = arith.constant 19 : index
    %19 = memref.load %arg1[%c19] : memref<229xf32, #tpu.memory_space<smem>>
    %c20 = arith.constant 20 : index
    %20 = memref.load %arg1[%c20] : memref<229xf32, #tpu.memory_space<smem>>
    %c21 = arith.constant 21 : index
    %21 = memref.load %arg1[%c21] : memref<229xf32, #tpu.memory_space<smem>>
    %c22 = arith.constant 22 : index
    %22 = memref.load %arg1[%c22] : memref<229xf32, #tpu.memory_space<smem>>
    %c23 = arith.constant 23 : index
    %23 = memref.load %arg1[%c23] : memref<229xf32, #tpu.memory_space<smem>>
    %c24 = arith.constant 24 : index
    %24 = memref.load %arg1[%c24] : memref<229xf32, #tpu.memory_space<smem>>
    %c25 = arith.constant 25 : index
    %25 = memref.load %arg1[%c25] : memref<229xf32, #tpu.memory_space<smem>>
    %c26 = arith.constant 26 : index
    %26 = memref.load %arg1[%c26] : memref<229xf32, #tpu.memory_space<smem>>
    %c27 = arith.constant 27 : index
    %27 = memref.load %arg1[%c27] : memref<229xf32, #tpu.memory_space<smem>>
    %c28 = arith.constant 28 : index
    %28 = memref.load %arg1[%c28] : memref<229xf32, #tpu.memory_space<smem>>
    %c29 = arith.constant 29 : index
    %29 = memref.load %arg1[%c29] : memref<229xf32, #tpu.memory_space<smem>>
    %c30 = arith.constant 30 : index
    %30 = memref.load %arg1[%c30] : memref<229xf32, #tpu.memory_space<smem>>
    %c31 = arith.constant 31 : index
    %31 = memref.load %arg1[%c31] : memref<229xf32, #tpu.memory_space<smem>>
    %c32 = arith.constant 32 : index
    %32 = memref.load %arg1[%c32] : memref<229xf32, #tpu.memory_space<smem>>
    %c33 = arith.constant 33 : index
    %33 = memref.load %arg1[%c33] : memref<229xf32, #tpu.memory_space<smem>>
    %c34 = arith.constant 34 : index
    %34 = memref.load %arg1[%c34] : memref<229xf32, #tpu.memory_space<smem>>
    %c35 = arith.constant 35 : index
    %35 = memref.load %arg1[%c35] : memref<229xf32, #tpu.memory_space<smem>>
    %c36 = arith.constant 36 : index
    %36 = memref.load %arg1[%c36] : memref<229xf32, #tpu.memory_space<smem>>
    %c37 = arith.constant 37 : index
    %37 = memref.load %arg1[%c37] : memref<229xf32, #tpu.memory_space<smem>>
    %c38 = arith.constant 38 : index
    %38 = memref.load %arg1[%c38] : memref<229xf32, #tpu.memory_space<smem>>
    %c39 = arith.constant 39 : index
    %39 = memref.load %arg1[%c39] : memref<229xf32, #tpu.memory_space<smem>>
    %c40 = arith.constant 40 : index
    %40 = memref.load %arg1[%c40] : memref<229xf32, #tpu.memory_space<smem>>
    %c41 = arith.constant 41 : index
    %41 = memref.load %arg1[%c41] : memref<229xf32, #tpu.memory_space<smem>>
    %c42 = arith.constant 42 : index
    %42 = memref.load %arg1[%c42] : memref<229xf32, #tpu.memory_space<smem>>
    %c43 = arith.constant 43 : index
    %43 = memref.load %arg1[%c43] : memref<229xf32, #tpu.memory_space<smem>>
    %c44 = arith.constant 44 : index
    %44 = memref.load %arg1[%c44] : memref<229xf32, #tpu.memory_space<smem>>
    %c45 = arith.constant 45 : index
    %45 = memref.load %arg1[%c45] : memref<229xf32, #tpu.memory_space<smem>>
    %c46 = arith.constant 46 : index
    %46 = memref.load %arg1[%c46] : memref<229xf32, #tpu.memory_space<smem>>
    %c47 = arith.constant 47 : index
    %47 = memref.load %arg1[%c47] : memref<229xf32, #tpu.memory_space<smem>>
    %c48 = arith.constant 48 : index
    %48 = memref.load %arg1[%c48] : memref<229xf32, #tpu.memory_space<smem>>
    %c49 = arith.constant 49 : index
    %49 = memref.load %arg1[%c49] : memref<229xf32, #tpu.memory_space<smem>>
    %c50 = arith.constant 50 : index
    %50 = memref.load %arg1[%c50] : memref<229xf32, #tpu.memory_space<smem>>
    %c51 = arith.constant 51 : index
    %51 = memref.load %arg1[%c51] : memref<229xf32, #tpu.memory_space<smem>>
    %c52 = arith.constant 52 : index
    %52 = memref.load %arg1[%c52] : memref<229xf32, #tpu.memory_space<smem>>
    %c53 = arith.constant 53 : index
    %53 = memref.load %arg1[%c53] : memref<229xf32, #tpu.memory_space<smem>>
    %c54 = arith.constant 54 : index
    %54 = memref.load %arg1[%c54] : memref<229xf32, #tpu.memory_space<smem>>
    %c55 = arith.constant 55 : index
    %55 = memref.load %arg1[%c55] : memref<229xf32, #tpu.memory_space<smem>>
    %c56 = arith.constant 56 : index
    %56 = memref.load %arg1[%c56] : memref<229xf32, #tpu.memory_space<smem>>
    %c57 = arith.constant 57 : index
    %57 = memref.load %arg1[%c57] : memref<229xf32, #tpu.memory_space<smem>>
    %c58 = arith.constant 58 : index
    %58 = memref.load %arg1[%c58] : memref<229xf32, #tpu.memory_space<smem>>
    %c59 = arith.constant 59 : index
    %59 = memref.load %arg1[%c59] : memref<229xf32, #tpu.memory_space<smem>>
    %c60 = arith.constant 60 : index
    %60 = memref.load %arg1[%c60] : memref<229xf32, #tpu.memory_space<smem>>
    %c61 = arith.constant 61 : index
    %61 = memref.load %arg1[%c61] : memref<229xf32, #tpu.memory_space<smem>>
    %c62 = arith.constant 62 : index
    %62 = memref.load %arg1[%c62] : memref<229xf32, #tpu.memory_space<smem>>
    %c63 = arith.constant 63 : index
    %63 = memref.load %arg1[%c63] : memref<229xf32, #tpu.memory_space<smem>>
    %c64 = arith.constant 64 : index
    %64 = memref.load %arg1[%c64] : memref<229xf32, #tpu.memory_space<smem>>
    %c65 = arith.constant 65 : index
    %65 = memref.load %arg1[%c65] : memref<229xf32, #tpu.memory_space<smem>>
    %c66 = arith.constant 66 : index
    %66 = memref.load %arg1[%c66] : memref<229xf32, #tpu.memory_space<smem>>
    %c67 = arith.constant 67 : index
    %67 = memref.load %arg1[%c67] : memref<229xf32, #tpu.memory_space<smem>>
    %c68 = arith.constant 68 : index
    %68 = memref.load %arg1[%c68] : memref<229xf32, #tpu.memory_space<smem>>
    %c69 = arith.constant 69 : index
    %69 = memref.load %arg1[%c69] : memref<229xf32, #tpu.memory_space<smem>>
    %c70 = arith.constant 70 : index
    %70 = memref.load %arg1[%c70] : memref<229xf32, #tpu.memory_space<smem>>
    %c71 = arith.constant 71 : index
    %71 = memref.load %arg1[%c71] : memref<229xf32, #tpu.memory_space<smem>>
    %c72 = arith.constant 72 : index
    %72 = memref.load %arg1[%c72] : memref<229xf32, #tpu.memory_space<smem>>
    %c73 = arith.constant 73 : index
    %73 = memref.load %arg1[%c73] : memref<229xf32, #tpu.memory_space<smem>>
    %c74 = arith.constant 74 : index
    %74 = memref.load %arg1[%c74] : memref<229xf32, #tpu.memory_space<smem>>
    %c75 = arith.constant 75 : index
    %75 = memref.load %arg1[%c75] : memref<229xf32, #tpu.memory_space<smem>>
    %c76 = arith.constant 76 : index
    %76 = memref.load %arg1[%c76] : memref<229xf32, #tpu.memory_space<smem>>
    %c77 = arith.constant 77 : index
    %77 = memref.load %arg1[%c77] : memref<229xf32, #tpu.memory_space<smem>>
    %c78 = arith.constant 78 : index
    %78 = memref.load %arg1[%c78] : memref<229xf32, #tpu.memory_space<smem>>
    %c79 = arith.constant 79 : index
    %79 = memref.load %arg1[%c79] : memref<229xf32, #tpu.memory_space<smem>>
    %c80 = arith.constant 80 : index
    %80 = memref.load %arg1[%c80] : memref<229xf32, #tpu.memory_space<smem>>
    %c81 = arith.constant 81 : index
    %81 = memref.load %arg1[%c81] : memref<229xf32, #tpu.memory_space<smem>>
    %c82 = arith.constant 82 : index
    %82 = memref.load %arg1[%c82] : memref<229xf32, #tpu.memory_space<smem>>
    %c83 = arith.constant 83 : index
    %83 = memref.load %arg1[%c83] : memref<229xf32, #tpu.memory_space<smem>>
    %c84 = arith.constant 84 : index
    %84 = memref.load %arg1[%c84] : memref<229xf32, #tpu.memory_space<smem>>
    %c85 = arith.constant 85 : index
    %85 = memref.load %arg1[%c85] : memref<229xf32, #tpu.memory_space<smem>>
    %c86 = arith.constant 86 : index
    %86 = memref.load %arg1[%c86] : memref<229xf32, #tpu.memory_space<smem>>
    %c87 = arith.constant 87 : index
    %87 = memref.load %arg1[%c87] : memref<229xf32, #tpu.memory_space<smem>>
    %c88 = arith.constant 88 : index
    %88 = memref.load %arg1[%c88] : memref<229xf32, #tpu.memory_space<smem>>
    %c89 = arith.constant 89 : index
    %89 = memref.load %arg1[%c89] : memref<229xf32, #tpu.memory_space<smem>>
    %c90 = arith.constant 90 : index
    %90 = memref.load %arg1[%c90] : memref<229xf32, #tpu.memory_space<smem>>
    %c91 = arith.constant 91 : index
    %91 = memref.load %arg1[%c91] : memref<229xf32, #tpu.memory_space<smem>>
    %c92 = arith.constant 92 : index
    %92 = memref.load %arg1[%c92] : memref<229xf32, #tpu.memory_space<smem>>
    %c93 = arith.constant 93 : index
    %93 = memref.load %arg1[%c93] : memref<229xf32, #tpu.memory_space<smem>>
    %c94 = arith.constant 94 : index
    %94 = memref.load %arg1[%c94] : memref<229xf32, #tpu.memory_space<smem>>
    %c95 = arith.constant 95 : index
    %95 = memref.load %arg1[%c95] : memref<229xf32, #tpu.memory_space<smem>>
    %c96 = arith.constant 96 : index
    %96 = memref.load %arg1[%c96] : memref<229xf32, #tpu.memory_space<smem>>
    %c97 = arith.constant 97 : index
    %97 = memref.load %arg1[%c97] : memref<229xf32, #tpu.memory_space<smem>>
    %c98 = arith.constant 98 : index
    %98 = memref.load %arg1[%c98] : memref<229xf32, #tpu.memory_space<smem>>
    %c99 = arith.constant 99 : index
    %99 = memref.load %arg1[%c99] : memref<229xf32, #tpu.memory_space<smem>>
    %c100 = arith.constant 100 : index
    %100 = memref.load %arg1[%c100] : memref<229xf32, #tpu.memory_space<smem>>
    %c101 = arith.constant 101 : index
    %101 = memref.load %arg1[%c101] : memref<229xf32, #tpu.memory_space<smem>>
    %c102 = arith.constant 102 : index
    %102 = memref.load %arg1[%c102] : memref<229xf32, #tpu.memory_space<smem>>
    %c103 = arith.constant 103 : index
    %103 = memref.load %arg1[%c103] : memref<229xf32, #tpu.memory_space<smem>>
    %c104 = arith.constant 104 : index
    %104 = memref.load %arg1[%c104] : memref<229xf32, #tpu.memory_space<smem>>
    %c105 = arith.constant 105 : index
    %105 = memref.load %arg1[%c105] : memref<229xf32, #tpu.memory_space<smem>>
    %c106 = arith.constant 106 : index
    %106 = memref.load %arg1[%c106] : memref<229xf32, #tpu.memory_space<smem>>
    %c107 = arith.constant 107 : index
    %107 = memref.load %arg1[%c107] : memref<229xf32, #tpu.memory_space<smem>>
    %c108 = arith.constant 108 : index
    %108 = memref.load %arg1[%c108] : memref<229xf32, #tpu.memory_space<smem>>
    %c109 = arith.constant 109 : index
    %109 = memref.load %arg1[%c109] : memref<229xf32, #tpu.memory_space<smem>>
    %c110 = arith.constant 110 : index
    %110 = memref.load %arg1[%c110] : memref<229xf32, #tpu.memory_space<smem>>
    %c111 = arith.constant 111 : index
    %111 = memref.load %arg1[%c111] : memref<229xf32, #tpu.memory_space<smem>>
    %c112 = arith.constant 112 : index
    %112 = memref.load %arg1[%c112] : memref<229xf32, #tpu.memory_space<smem>>
    %c113 = arith.constant 113 : index
    %113 = memref.load %arg1[%c113] : memref<229xf32, #tpu.memory_space<smem>>
    %c114 = arith.constant 114 : index
    %114 = memref.load %arg1[%c114] : memref<229xf32, #tpu.memory_space<smem>>
    %c115 = arith.constant 115 : index
    %115 = memref.load %arg1[%c115] : memref<229xf32, #tpu.memory_space<smem>>
    %c116 = arith.constant 116 : index
    %116 = memref.load %arg1[%c116] : memref<229xf32, #tpu.memory_space<smem>>
    %c117 = arith.constant 117 : index
    %117 = memref.load %arg1[%c117] : memref<229xf32, #tpu.memory_space<smem>>
    %c118 = arith.constant 118 : index
    %118 = memref.load %arg1[%c118] : memref<229xf32, #tpu.memory_space<smem>>
    %c119 = arith.constant 119 : index
    %119 = memref.load %arg1[%c119] : memref<229xf32, #tpu.memory_space<smem>>
    %c120 = arith.constant 120 : index
    %120 = memref.load %arg1[%c120] : memref<229xf32, #tpu.memory_space<smem>>
    %c121 = arith.constant 121 : index
    %121 = memref.load %arg1[%c121] : memref<229xf32, #tpu.memory_space<smem>>
    %c122 = arith.constant 122 : index
    %122 = memref.load %arg1[%c122] : memref<229xf32, #tpu.memory_space<smem>>
    %c123 = arith.constant 123 : index
    %123 = memref.load %arg1[%c123] : memref<229xf32, #tpu.memory_space<smem>>
    %c124 = arith.constant 124 : index
    %124 = memref.load %arg1[%c124] : memref<229xf32, #tpu.memory_space<smem>>
    %c125 = arith.constant 125 : index
    %125 = memref.load %arg1[%c125] : memref<229xf32, #tpu.memory_space<smem>>
    %c126 = arith.constant 126 : index
    %126 = memref.load %arg1[%c126] : memref<229xf32, #tpu.memory_space<smem>>
    %c127 = arith.constant 127 : index
    %127 = memref.load %arg1[%c127] : memref<229xf32, #tpu.memory_space<smem>>
    %c128 = arith.constant 128 : index
    %128 = memref.load %arg1[%c128] : memref<229xf32, #tpu.memory_space<smem>>
    %c129 = arith.constant 129 : index
    %129 = memref.load %arg1[%c129] : memref<229xf32, #tpu.memory_space<smem>>
    %c130 = arith.constant 130 : index
    %130 = memref.load %arg1[%c130] : memref<229xf32, #tpu.memory_space<smem>>
    %c131 = arith.constant 131 : index
    %131 = memref.load %arg1[%c131] : memref<229xf32, #tpu.memory_space<smem>>
    %c132 = arith.constant 132 : index
    %132 = memref.load %arg1[%c132] : memref<229xf32, #tpu.memory_space<smem>>
    %c133 = arith.constant 133 : index
    %133 = memref.load %arg1[%c133] : memref<229xf32, #tpu.memory_space<smem>>
    %c134 = arith.constant 134 : index
    %134 = memref.load %arg1[%c134] : memref<229xf32, #tpu.memory_space<smem>>
    %c135 = arith.constant 135 : index
    %135 = memref.load %arg1[%c135] : memref<229xf32, #tpu.memory_space<smem>>
    %c136 = arith.constant 136 : index
    %136 = memref.load %arg1[%c136] : memref<229xf32, #tpu.memory_space<smem>>
    %c137 = arith.constant 137 : index
    %137 = memref.load %arg1[%c137] : memref<229xf32, #tpu.memory_space<smem>>
    %c138 = arith.constant 138 : index
    %138 = memref.load %arg1[%c138] : memref<229xf32, #tpu.memory_space<smem>>
    %c139 = arith.constant 139 : index
    %139 = memref.load %arg1[%c139] : memref<229xf32, #tpu.memory_space<smem>>
    %c140 = arith.constant 140 : index
    %140 = memref.load %arg1[%c140] : memref<229xf32, #tpu.memory_space<smem>>
    %c141 = arith.constant 141 : index
    %141 = memref.load %arg1[%c141] : memref<229xf32, #tpu.memory_space<smem>>
    %c142 = arith.constant 142 : index
    %142 = memref.load %arg1[%c142] : memref<229xf32, #tpu.memory_space<smem>>
    %c143 = arith.constant 143 : index
    %143 = memref.load %arg1[%c143] : memref<229xf32, #tpu.memory_space<smem>>
    %c144 = arith.constant 144 : index
    %144 = memref.load %arg1[%c144] : memref<229xf32, #tpu.memory_space<smem>>
    %c145 = arith.constant 145 : index
    %145 = memref.load %arg1[%c145] : memref<229xf32, #tpu.memory_space<smem>>
    %c146 = arith.constant 146 : index
    %146 = memref.load %arg1[%c146] : memref<229xf32, #tpu.memory_space<smem>>
    %c147 = arith.constant 147 : index
    %147 = memref.load %arg1[%c147] : memref<229xf32, #tpu.memory_space<smem>>
    %c148 = arith.constant 148 : index
    %148 = memref.load %arg1[%c148] : memref<229xf32, #tpu.memory_space<smem>>
    %c149 = arith.constant 149 : index
    %149 = memref.load %arg1[%c149] : memref<229xf32, #tpu.memory_space<smem>>
    %c150 = arith.constant 150 : index
    %150 = memref.load %arg1[%c150] : memref<229xf32, #tpu.memory_space<smem>>
    %c151 = arith.constant 151 : index
    %151 = memref.load %arg1[%c151] : memref<229xf32, #tpu.memory_space<smem>>
    %c152 = arith.constant 152 : index
    %152 = memref.load %arg1[%c152] : memref<229xf32, #tpu.memory_space<smem>>
    %c153 = arith.constant 153 : index
    %153 = memref.load %arg1[%c153] : memref<229xf32, #tpu.memory_space<smem>>
    %c154 = arith.constant 154 : index
    %154 = memref.load %arg1[%c154] : memref<229xf32, #tpu.memory_space<smem>>
    %c155 = arith.constant 155 : index
    %155 = memref.load %arg1[%c155] : memref<229xf32, #tpu.memory_space<smem>>
    %c156 = arith.constant 156 : index
    %156 = memref.load %arg1[%c156] : memref<229xf32, #tpu.memory_space<smem>>
    %c157 = arith.constant 157 : index
    %157 = memref.load %arg1[%c157] : memref<229xf32, #tpu.memory_space<smem>>
    %c158 = arith.constant 158 : index
    %158 = memref.load %arg1[%c158] : memref<229xf32, #tpu.memory_space<smem>>
    %c159 = arith.constant 159 : index
    %159 = memref.load %arg1[%c159] : memref<229xf32, #tpu.memory_space<smem>>
    %c160 = arith.constant 160 : index
    %160 = memref.load %arg1[%c160] : memref<229xf32, #tpu.memory_space<smem>>
    %c161 = arith.constant 161 : index
    %161 = memref.load %arg1[%c161] : memref<229xf32, #tpu.memory_space<smem>>
    %c162 = arith.constant 162 : index
    %162 = memref.load %arg1[%c162] : memref<229xf32, #tpu.memory_space<smem>>
    %c163 = arith.constant 163 : index
    %163 = memref.load %arg1[%c163] : memref<229xf32, #tpu.memory_space<smem>>
    %c164 = arith.constant 164 : index
    %164 = memref.load %arg1[%c164] : memref<229xf32, #tpu.memory_space<smem>>
    %c165 = arith.constant 165 : index
    %165 = memref.load %arg1[%c165] : memref<229xf32, #tpu.memory_space<smem>>
    %c166 = arith.constant 166 : index
    %166 = memref.load %arg1[%c166] : memref<229xf32, #tpu.memory_space<smem>>
    %c167 = arith.constant 167 : index
    %167 = memref.load %arg1[%c167] : memref<229xf32, #tpu.memory_space<smem>>
    %c168 = arith.constant 168 : index
    %168 = memref.load %arg1[%c168] : memref<229xf32, #tpu.memory_space<smem>>
    %c169 = arith.constant 169 : index
    %169 = memref.load %arg1[%c169] : memref<229xf32, #tpu.memory_space<smem>>
    %c170 = arith.constant 170 : index
    %170 = memref.load %arg1[%c170] : memref<229xf32, #tpu.memory_space<smem>>
    %c171 = arith.constant 171 : index
    %171 = memref.load %arg1[%c171] : memref<229xf32, #tpu.memory_space<smem>>
    %c172 = arith.constant 172 : index
    %172 = memref.load %arg1[%c172] : memref<229xf32, #tpu.memory_space<smem>>
    %c173 = arith.constant 173 : index
    %173 = memref.load %arg1[%c173] : memref<229xf32, #tpu.memory_space<smem>>
    %c174 = arith.constant 174 : index
    %174 = memref.load %arg1[%c174] : memref<229xf32, #tpu.memory_space<smem>>
    %c175 = arith.constant 175 : index
    %175 = memref.load %arg1[%c175] : memref<229xf32, #tpu.memory_space<smem>>
    %c176 = arith.constant 176 : index
    %176 = memref.load %arg1[%c176] : memref<229xf32, #tpu.memory_space<smem>>
    %c177 = arith.constant 177 : index
    %177 = memref.load %arg1[%c177] : memref<229xf32, #tpu.memory_space<smem>>
    %c178 = arith.constant 178 : index
    %178 = memref.load %arg1[%c178] : memref<229xf32, #tpu.memory_space<smem>>
    %c179 = arith.constant 179 : index
    %179 = memref.load %arg1[%c179] : memref<229xf32, #tpu.memory_space<smem>>
    %c180 = arith.constant 180 : index
    %180 = memref.load %arg1[%c180] : memref<229xf32, #tpu.memory_space<smem>>
    %c181 = arith.constant 181 : index
    %181 = memref.load %arg1[%c181] : memref<229xf32, #tpu.memory_space<smem>>
    %c182 = arith.constant 182 : index
    %182 = memref.load %arg1[%c182] : memref<229xf32, #tpu.memory_space<smem>>
    %c183 = arith.constant 183 : index
    %183 = memref.load %arg1[%c183] : memref<229xf32, #tpu.memory_space<smem>>
    %c184 = arith.constant 184 : index
    %184 = memref.load %arg1[%c184] : memref<229xf32, #tpu.memory_space<smem>>
    %c185 = arith.constant 185 : index
    %185 = memref.load %arg1[%c185] : memref<229xf32, #tpu.memory_space<smem>>
    %c186 = arith.constant 186 : index
    %186 = memref.load %arg1[%c186] : memref<229xf32, #tpu.memory_space<smem>>
    %c187 = arith.constant 187 : index
    %187 = memref.load %arg1[%c187] : memref<229xf32, #tpu.memory_space<smem>>
    %c188 = arith.constant 188 : index
    %188 = memref.load %arg1[%c188] : memref<229xf32, #tpu.memory_space<smem>>
    %c189 = arith.constant 189 : index
    %189 = memref.load %arg1[%c189] : memref<229xf32, #tpu.memory_space<smem>>
    %c190 = arith.constant 190 : index
    %190 = memref.load %arg1[%c190] : memref<229xf32, #tpu.memory_space<smem>>
    %c191 = arith.constant 191 : index
    %191 = memref.load %arg1[%c191] : memref<229xf32, #tpu.memory_space<smem>>
    %c192 = arith.constant 192 : index
    %192 = memref.load %arg1[%c192] : memref<229xf32, #tpu.memory_space<smem>>
    %c193 = arith.constant 193 : index
    %193 = memref.load %arg1[%c193] : memref<229xf32, #tpu.memory_space<smem>>
    %c194 = arith.constant 194 : index
    %194 = memref.load %arg1[%c194] : memref<229xf32, #tpu.memory_space<smem>>
    %c195 = arith.constant 195 : index
    %195 = memref.load %arg1[%c195] : memref<229xf32, #tpu.memory_space<smem>>
    %c196 = arith.constant 196 : index
    %196 = memref.load %arg1[%c196] : memref<229xf32, #tpu.memory_space<smem>>
    %c197 = arith.constant 197 : index
    %197 = memref.load %arg1[%c197] : memref<229xf32, #tpu.memory_space<smem>>
    %c198 = arith.constant 198 : index
    %198 = memref.load %arg1[%c198] : memref<229xf32, #tpu.memory_space<smem>>
    %c199 = arith.constant 199 : index
    %199 = memref.load %arg1[%c199] : memref<229xf32, #tpu.memory_space<smem>>
    %c200 = arith.constant 200 : index
    %200 = memref.load %arg1[%c200] : memref<229xf32, #tpu.memory_space<smem>>
    %c201 = arith.constant 201 : index
    %201 = memref.load %arg1[%c201] : memref<229xf32, #tpu.memory_space<smem>>
    %c202 = arith.constant 202 : index
    %202 = memref.load %arg1[%c202] : memref<229xf32, #tpu.memory_space<smem>>
    %c203 = arith.constant 203 : index
    %203 = memref.load %arg1[%c203] : memref<229xf32, #tpu.memory_space<smem>>
    %c204 = arith.constant 204 : index
    %204 = memref.load %arg1[%c204] : memref<229xf32, #tpu.memory_space<smem>>
    %c205 = arith.constant 205 : index
    %205 = memref.load %arg1[%c205] : memref<229xf32, #tpu.memory_space<smem>>
    %c206 = arith.constant 206 : index
    %206 = memref.load %arg1[%c206] : memref<229xf32, #tpu.memory_space<smem>>
    %c207 = arith.constant 207 : index
    %207 = memref.load %arg1[%c207] : memref<229xf32, #tpu.memory_space<smem>>
    %c208 = arith.constant 208 : index
    %208 = memref.load %arg1[%c208] : memref<229xf32, #tpu.memory_space<smem>>
    %c209 = arith.constant 209 : index
    %209 = memref.load %arg1[%c209] : memref<229xf32, #tpu.memory_space<smem>>
    %c210 = arith.constant 210 : index
    %210 = memref.load %arg1[%c210] : memref<229xf32, #tpu.memory_space<smem>>
    %c211 = arith.constant 211 : index
    %211 = memref.load %arg1[%c211] : memref<229xf32, #tpu.memory_space<smem>>
    %c212 = arith.constant 212 : index
    %212 = memref.load %arg1[%c212] : memref<229xf32, #tpu.memory_space<smem>>
    %c213 = arith.constant 213 : index
    %213 = memref.load %arg1[%c213] : memref<229xf32, #tpu.memory_space<smem>>
    %c214 = arith.constant 214 : index
    %214 = memref.load %arg1[%c214] : memref<229xf32, #tpu.memory_space<smem>>
    %c215 = arith.constant 215 : index
    %215 = memref.load %arg1[%c215] : memref<229xf32, #tpu.memory_space<smem>>
    %c216 = arith.constant 216 : index
    %216 = memref.load %arg1[%c216] : memref<229xf32, #tpu.memory_space<smem>>
    %c217 = arith.constant 217 : index
    %217 = memref.load %arg1[%c217] : memref<229xf32, #tpu.memory_space<smem>>
    %c218 = arith.constant 218 : index
    %218 = memref.load %arg1[%c218] : memref<229xf32, #tpu.memory_space<smem>>
    %c219 = arith.constant 219 : index
    %219 = memref.load %arg1[%c219] : memref<229xf32, #tpu.memory_space<smem>>
    %c220 = arith.constant 220 : index
    %220 = memref.load %arg1[%c220] : memref<229xf32, #tpu.memory_space<smem>>
    %c221 = arith.constant 221 : index
    %221 = memref.load %arg1[%c221] : memref<229xf32, #tpu.memory_space<smem>>
    %c222 = arith.constant 222 : index
    %222 = memref.load %arg1[%c222] : memref<229xf32, #tpu.memory_space<smem>>
    %c223 = arith.constant 223 : index
    %223 = memref.load %arg1[%c223] : memref<229xf32, #tpu.memory_space<smem>>
    %c224 = arith.constant 224 : index
    %224 = memref.load %arg1[%c224] : memref<229xf32, #tpu.memory_space<smem>>
    %c225 = arith.constant 225 : index
    %225 = memref.load %arg1[%c225] : memref<229xf32, #tpu.memory_space<smem>>
    %c226 = arith.constant 226 : index
    %226 = memref.load %arg1[%c226] : memref<229xf32, #tpu.memory_space<smem>>
    %c227 = arith.constant 227 : index
    %227 = memref.load %arg1[%c227] : memref<229xf32, #tpu.memory_space<smem>>
    %c228 = arith.constant 228 : index
    %228 = memref.load %arg1[%c228] : memref<229xf32, #tpu.memory_space<smem>>
    %c0_i32 = arith.constant 0 : i32
    %c8_i32 = arith.constant 8 : i32
    %229 = arith.muli %c0_i32, %c8_i32 : i32
    %230 = tpu.assume_multiple %229, 8 : i32
    %c0_0 = arith.constant 0 : index
    %231 = arith.index_cast %230 : i32 to index
    %c0_1 = arith.constant 0 : index
    %232 = vector.load %arg2[%c0_0, %231, %c0_1] : memref<4x8x128xf32, #tpu.memory_space<vmem>>, vector<1x8x128xf32>
    %233 = vector.shape_cast %232 : vector<1x8x128xf32> to vector<8x128xf32>
    %c1_2 = arith.constant 1 : index
    %234 = arith.index_cast %230 : i32 to index
    %c0_3 = arith.constant 0 : index
    %235 = vector.load %arg2[%c1_2, %234, %c0_3] : memref<4x8x128xf32, #tpu.memory_space<vmem>>, vector<1x8x128xf32>
    %236 = vector.shape_cast %235 : vector<1x8x128xf32> to vector<8x128xf32>
    %c2_4 = arith.constant 2 : index
    %237 = arith.index_cast %230 : i32 to index
    %c0_5 = arith.constant 0 : index
    %238 = vector.load %arg2[%c2_4, %237, %c0_5] : memref<4x8x128xf32, #tpu.memory_space<vmem>>, vector<1x8x128xf32>
    %239 = vector.shape_cast %238 : vector<1x8x128xf32> to vector<8x128xf32>
    %c3_6 = arith.constant 3 : index
    %240 = arith.index_cast %230 : i32 to index
    %c0_7 = arith.constant 0 : index
    %241 = vector.load %arg2[%c3_6, %240, %c0_7] : memref<4x8x128xf32, #tpu.memory_space<vmem>>, vector<1x8x128xf32>
    %242 = vector.shape_cast %241 : vector<1x8x128xf32> to vector<8x128xf32>
    %243 = vector.broadcast %0 : f32 to vector<8x128xf32>
    %244 = arith.mulf %233, %243 : vector<8x128xf32>
    %245 = vector.broadcast %48 : f32 to vector<8x128xf32>
    %246 = arith.addf %244, %245 : vector<8x128xf32>
    %247 = vector.broadcast %1 : f32 to vector<8x128xf32>
    %248 = arith.mulf %236, %247 : vector<8x128xf32>
    %249 = arith.addf %246, %248 : vector<8x128xf32>
    %250 = vector.broadcast %2 : f32 to vector<8x128xf32>
    %251 = arith.mulf %239, %250 : vector<8x128xf32>
    %252 = arith.addf %249, %251 : vector<8x128xf32>
    %253 = vector.broadcast %3 : f32 to vector<8x128xf32>
    %254 = arith.mulf %242, %253 : vector<8x128xf32>
    %255 = arith.addf %252, %254 : vector<8x128xf32>
    %256 = math.tanh %255 : vector<8x128xf32>
    %257 = vector.broadcast %4 : f32 to vector<8x128xf32>
    %258 = arith.mulf %233, %257 : vector<8x128xf32>
    %259 = vector.broadcast %49 : f32 to vector<8x128xf32>
    %260 = arith.addf %258, %259 : vector<8x128xf32>
    %261 = vector.broadcast %5 : f32 to vector<8x128xf32>
    %262 = arith.mulf %236, %261 : vector<8x128xf32>
    %263 = arith.addf %260, %262 : vector<8x128xf32>
    %264 = vector.broadcast %6 : f32 to vector<8x128xf32>
    %265 = arith.mulf %239, %264 : vector<8x128xf32>
    %266 = arith.addf %263, %265 : vector<8x128xf32>
    %267 = vector.broadcast %7 : f32 to vector<8x128xf32>
    %268 = arith.mulf %242, %267 : vector<8x128xf32>
    %269 = arith.addf %266, %268 : vector<8x128xf32>
    %270 = math.tanh %269 : vector<8x128xf32>
    %271 = vector.broadcast %8 : f32 to vector<8x128xf32>
    %272 = arith.mulf %233, %271 : vector<8x128xf32>
    %273 = vector.broadcast %50 : f32 to vector<8x128xf32>
    %274 = arith.addf %272, %273 : vector<8x128xf32>
    %275 = vector.broadcast %9 : f32 to vector<8x128xf32>
    %276 = arith.mulf %236, %275 : vector<8x128xf32>
    %277 = arith.addf %274, %276 : vector<8x128xf32>
    %278 = vector.broadcast %10 : f32 to vector<8x128xf32>
    %279 = arith.mulf %239, %278 : vector<8x128xf32>
    %280 = arith.addf %277, %279 : vector<8x128xf32>
    %281 = vector.broadcast %11 : f32 to vector<8x128xf32>
    %282 = arith.mulf %242, %281 : vector<8x128xf32>
    %283 = arith.addf %280, %282 : vector<8x128xf32>
    %284 = math.tanh %283 : vector<8x128xf32>
    %285 = vector.broadcast %12 : f32 to vector<8x128xf32>
    %286 = arith.mulf %233, %285 : vector<8x128xf32>
    %287 = vector.broadcast %51 : f32 to vector<8x128xf32>
    %288 = arith.addf %286, %287 : vector<8x128xf32>
    %289 = vector.broadcast %13 : f32 to vector<8x128xf32>
    %290 = arith.mulf %236, %289 : vector<8x128xf32>
    %291 = arith.addf %288, %290 : vector<8x128xf32>
    %292 = vector.broadcast %14 : f32 to vector<8x128xf32>
    %293 = arith.mulf %239, %292 : vector<8x128xf32>
    %294 = arith.addf %291, %293 : vector<8x128xf32>
    %295 = vector.broadcast %15 : f32 to vector<8x128xf32>
    %296 = arith.mulf %242, %295 : vector<8x128xf32>
    %297 = arith.addf %294, %296 : vector<8x128xf32>
    %298 = math.tanh %297 : vector<8x128xf32>
    %299 = vector.broadcast %16 : f32 to vector<8x128xf32>
    %300 = arith.mulf %233, %299 : vector<8x128xf32>
    %301 = vector.broadcast %52 : f32 to vector<8x128xf32>
    %302 = arith.addf %300, %301 : vector<8x128xf32>
    %303 = vector.broadcast %17 : f32 to vector<8x128xf32>
    %304 = arith.mulf %236, %303 : vector<8x128xf32>
    %305 = arith.addf %302, %304 : vector<8x128xf32>
    %306 = vector.broadcast %18 : f32 to vector<8x128xf32>
    %307 = arith.mulf %239, %306 : vector<8x128xf32>
    %308 = arith.addf %305, %307 : vector<8x128xf32>
    %309 = vector.broadcast %19 : f32 to vector<8x128xf32>
    %310 = arith.mulf %242, %309 : vector<8x128xf32>
    %311 = arith.addf %308, %310 : vector<8x128xf32>
    %312 = math.tanh %311 : vector<8x128xf32>
    %313 = vector.broadcast %20 : f32 to vector<8x128xf32>
    %314 = arith.mulf %233, %313 : vector<8x128xf32>
    %315 = vector.broadcast %53 : f32 to vector<8x128xf32>
    %316 = arith.addf %314, %315 : vector<8x128xf32>
    %317 = vector.broadcast %21 : f32 to vector<8x128xf32>
    %318 = arith.mulf %236, %317 : vector<8x128xf32>
    %319 = arith.addf %316, %318 : vector<8x128xf32>
    %320 = vector.broadcast %22 : f32 to vector<8x128xf32>
    %321 = arith.mulf %239, %320 : vector<8x128xf32>
    %322 = arith.addf %319, %321 : vector<8x128xf32>
    %323 = vector.broadcast %23 : f32 to vector<8x128xf32>
    %324 = arith.mulf %242, %323 : vector<8x128xf32>
    %325 = arith.addf %322, %324 : vector<8x128xf32>
    %326 = math.tanh %325 : vector<8x128xf32>
    %327 = vector.broadcast %24 : f32 to vector<8x128xf32>
    %328 = arith.mulf %233, %327 : vector<8x128xf32>
    %329 = vector.broadcast %54 : f32 to vector<8x128xf32>
    %330 = arith.addf %328, %329 : vector<8x128xf32>
    %331 = vector.broadcast %25 : f32 to vector<8x128xf32>
    %332 = arith.mulf %236, %331 : vector<8x128xf32>
    %333 = arith.addf %330, %332 : vector<8x128xf32>
    %334 = vector.broadcast %26 : f32 to vector<8x128xf32>
    %335 = arith.mulf %239, %334 : vector<8x128xf32>
    %336 = arith.addf %333, %335 : vector<8x128xf32>
    %337 = vector.broadcast %27 : f32 to vector<8x128xf32>
    %338 = arith.mulf %242, %337 : vector<8x128xf32>
    %339 = arith.addf %336, %338 : vector<8x128xf32>
    %340 = math.tanh %339 : vector<8x128xf32>
    %341 = vector.broadcast %28 : f32 to vector<8x128xf32>
    %342 = arith.mulf %233, %341 : vector<8x128xf32>
    %343 = vector.broadcast %55 : f32 to vector<8x128xf32>
    %344 = arith.addf %342, %343 : vector<8x128xf32>
    %345 = vector.broadcast %29 : f32 to vector<8x128xf32>
    %346 = arith.mulf %236, %345 : vector<8x128xf32>
    %347 = arith.addf %344, %346 : vector<8x128xf32>
    %348 = vector.broadcast %30 : f32 to vector<8x128xf32>
    %349 = arith.mulf %239, %348 : vector<8x128xf32>
    %350 = arith.addf %347, %349 : vector<8x128xf32>
    %351 = vector.broadcast %31 : f32 to vector<8x128xf32>
    %352 = arith.mulf %242, %351 : vector<8x128xf32>
    %353 = arith.addf %350, %352 : vector<8x128xf32>
    %354 = math.tanh %353 : vector<8x128xf32>
    %355 = vector.broadcast %32 : f32 to vector<8x128xf32>
    %356 = arith.mulf %233, %355 : vector<8x128xf32>
    %357 = vector.broadcast %56 : f32 to vector<8x128xf32>
    %358 = arith.addf %356, %357 : vector<8x128xf32>
    %359 = vector.broadcast %33 : f32 to vector<8x128xf32>
    %360 = arith.mulf %236, %359 : vector<8x128xf32>
    %361 = arith.addf %358, %360 : vector<8x128xf32>
    %362 = vector.broadcast %34 : f32 to vector<8x128xf32>
    %363 = arith.mulf %239, %362 : vector<8x128xf32>
    %364 = arith.addf %361, %363 : vector<8x128xf32>
    %365 = vector.broadcast %35 : f32 to vector<8x128xf32>
    %366 = arith.mulf %242, %365 : vector<8x128xf32>
    %367 = arith.addf %364, %366 : vector<8x128xf32>
    %368 = math.tanh %367 : vector<8x128xf32>
    %369 = vector.broadcast %36 : f32 to vector<8x128xf32>
    %370 = arith.mulf %233, %369 : vector<8x128xf32>
    %371 = vector.broadcast %57 : f32 to vector<8x128xf32>
    %372 = arith.addf %370, %371 : vector<8x128xf32>
    %373 = vector.broadcast %37 : f32 to vector<8x128xf32>
    %374 = arith.mulf %236, %373 : vector<8x128xf32>
    %375 = arith.addf %372, %374 : vector<8x128xf32>
    %376 = vector.broadcast %38 : f32 to vector<8x128xf32>
    %377 = arith.mulf %239, %376 : vector<8x128xf32>
    %378 = arith.addf %375, %377 : vector<8x128xf32>
    %379 = vector.broadcast %39 : f32 to vector<8x128xf32>
    %380 = arith.mulf %242, %379 : vector<8x128xf32>
    %381 = arith.addf %378, %380 : vector<8x128xf32>
    %382 = math.tanh %381 : vector<8x128xf32>
    %383 = vector.broadcast %40 : f32 to vector<8x128xf32>
    %384 = arith.mulf %233, %383 : vector<8x128xf32>
    %385 = vector.broadcast %58 : f32 to vector<8x128xf32>
    %386 = arith.addf %384, %385 : vector<8x128xf32>
    %387 = vector.broadcast %41 : f32 to vector<8x128xf32>
    %388 = arith.mulf %236, %387 : vector<8x128xf32>
    %389 = arith.addf %386, %388 : vector<8x128xf32>
    %390 = vector.broadcast %42 : f32 to vector<8x128xf32>
    %391 = arith.mulf %239, %390 : vector<8x128xf32>
    %392 = arith.addf %389, %391 : vector<8x128xf32>
    %393 = vector.broadcast %43 : f32 to vector<8x128xf32>
    %394 = arith.mulf %242, %393 : vector<8x128xf32>
    %395 = arith.addf %392, %394 : vector<8x128xf32>
    %396 = math.tanh %395 : vector<8x128xf32>
    %397 = vector.broadcast %44 : f32 to vector<8x128xf32>
    %398 = arith.mulf %233, %397 : vector<8x128xf32>
    %399 = vector.broadcast %59 : f32 to vector<8x128xf32>
    %400 = arith.addf %398, %399 : vector<8x128xf32>
    %401 = vector.broadcast %45 : f32 to vector<8x128xf32>
    %402 = arith.mulf %236, %401 : vector<8x128xf32>
    %403 = arith.addf %400, %402 : vector<8x128xf32>
    %404 = vector.broadcast %46 : f32 to vector<8x128xf32>
    %405 = arith.mulf %239, %404 : vector<8x128xf32>
    %406 = arith.addf %403, %405 : vector<8x128xf32>
    %407 = vector.broadcast %47 : f32 to vector<8x128xf32>
    %408 = arith.mulf %242, %407 : vector<8x128xf32>
    %409 = arith.addf %406, %408 : vector<8x128xf32>
    %410 = math.tanh %409 : vector<8x128xf32>
    %411 = vector.broadcast %60 : f32 to vector<8x128xf32>
    %412 = arith.mulf %256, %411 : vector<8x128xf32>
    %413 = vector.broadcast %204 : f32 to vector<8x128xf32>
    %414 = arith.addf %412, %413 : vector<8x128xf32>
    %415 = vector.broadcast %61 : f32 to vector<8x128xf32>
    %416 = arith.mulf %270, %415 : vector<8x128xf32>
    %417 = arith.addf %414, %416 : vector<8x128xf32>
    %418 = vector.broadcast %62 : f32 to vector<8x128xf32>
    %419 = arith.mulf %284, %418 : vector<8x128xf32>
    %420 = arith.addf %417, %419 : vector<8x128xf32>
    %421 = vector.broadcast %63 : f32 to vector<8x128xf32>
    %422 = arith.mulf %298, %421 : vector<8x128xf32>
    %423 = arith.addf %420, %422 : vector<8x128xf32>
    %424 = vector.broadcast %64 : f32 to vector<8x128xf32>
    %425 = arith.mulf %312, %424 : vector<8x128xf32>
    %426 = arith.addf %423, %425 : vector<8x128xf32>
    %427 = vector.broadcast %65 : f32 to vector<8x128xf32>
    %428 = arith.mulf %326, %427 : vector<8x128xf32>
    %429 = arith.addf %426, %428 : vector<8x128xf32>
    %430 = vector.broadcast %66 : f32 to vector<8x128xf32>
    %431 = arith.mulf %340, %430 : vector<8x128xf32>
    %432 = arith.addf %429, %431 : vector<8x128xf32>
    %433 = vector.broadcast %67 : f32 to vector<8x128xf32>
    %434 = arith.mulf %354, %433 : vector<8x128xf32>
    %435 = arith.addf %432, %434 : vector<8x128xf32>
    %436 = vector.broadcast %68 : f32 to vector<8x128xf32>
    %437 = arith.mulf %368, %436 : vector<8x128xf32>
    %438 = arith.addf %435, %437 : vector<8x128xf32>
    %439 = vector.broadcast %69 : f32 to vector<8x128xf32>
    %440 = arith.mulf %382, %439 : vector<8x128xf32>
    %441 = arith.addf %438, %440 : vector<8x128xf32>
    %442 = vector.broadcast %70 : f32 to vector<8x128xf32>
    %443 = arith.mulf %396, %442 : vector<8x128xf32>
    %444 = arith.addf %441, %443 : vector<8x128xf32>
    %445 = vector.broadcast %71 : f32 to vector<8x128xf32>
    %446 = arith.mulf %410, %445 : vector<8x128xf32>
    %447 = arith.addf %444, %446 : vector<8x128xf32>
    %448 = math.tanh %447 : vector<8x128xf32>
    %449 = vector.broadcast %72 : f32 to vector<8x128xf32>
    %450 = arith.mulf %256, %449 : vector<8x128xf32>
    %451 = vector.broadcast %205 : f32 to vector<8x128xf32>
    %452 = arith.addf %450, %451 : vector<8x128xf32>
    %453 = vector.broadcast %73 : f32 to vector<8x128xf32>
    %454 = arith.mulf %270, %453 : vector<8x128xf32>
    %455 = arith.addf %452, %454 : vector<8x128xf32>
    %456 = vector.broadcast %74 : f32 to vector<8x128xf32>
    %457 = arith.mulf %284, %456 : vector<8x128xf32>
    %458 = arith.addf %455, %457 : vector<8x128xf32>
    %459 = vector.broadcast %75 : f32 to vector<8x128xf32>
    %460 = arith.mulf %298, %459 : vector<8x128xf32>
    %461 = arith.addf %458, %460 : vector<8x128xf32>
    %462 = vector.broadcast %76 : f32 to vector<8x128xf32>
    %463 = arith.mulf %312, %462 : vector<8x128xf32>
    %464 = arith.addf %461, %463 : vector<8x128xf32>
    %465 = vector.broadcast %77 : f32 to vector<8x128xf32>
    %466 = arith.mulf %326, %465 : vector<8x128xf32>
    %467 = arith.addf %464, %466 : vector<8x128xf32>
    %468 = vector.broadcast %78 : f32 to vector<8x128xf32>
    %469 = arith.mulf %340, %468 : vector<8x128xf32>
    %470 = arith.addf %467, %469 : vector<8x128xf32>
    %471 = vector.broadcast %79 : f32 to vector<8x128xf32>
    %472 = arith.mulf %354, %471 : vector<8x128xf32>
    %473 = arith.addf %470, %472 : vector<8x128xf32>
    %474 = vector.broadcast %80 : f32 to vector<8x128xf32>
    %475 = arith.mulf %368, %474 : vector<8x128xf32>
    %476 = arith.addf %473, %475 : vector<8x128xf32>
    %477 = vector.broadcast %81 : f32 to vector<8x128xf32>
    %478 = arith.mulf %382, %477 : vector<8x128xf32>
    %479 = arith.addf %476, %478 : vector<8x128xf32>
    %480 = vector.broadcast %82 : f32 to vector<8x128xf32>
    %481 = arith.mulf %396, %480 : vector<8x128xf32>
    %482 = arith.addf %479, %481 : vector<8x128xf32>
    %483 = vector.broadcast %83 : f32 to vector<8x128xf32>
    %484 = arith.mulf %410, %483 : vector<8x128xf32>
    %485 = arith.addf %482, %484 : vector<8x128xf32>
    %486 = math.tanh %485 : vector<8x128xf32>
    %487 = vector.broadcast %84 : f32 to vector<8x128xf32>
    %488 = arith.mulf %256, %487 : vector<8x128xf32>
    %489 = vector.broadcast %206 : f32 to vector<8x128xf32>
    %490 = arith.addf %488, %489 : vector<8x128xf32>
    %491 = vector.broadcast %85 : f32 to vector<8x128xf32>
    %492 = arith.mulf %270, %491 : vector<8x128xf32>
    %493 = arith.addf %490, %492 : vector<8x128xf32>
    %494 = vector.broadcast %86 : f32 to vector<8x128xf32>
    %495 = arith.mulf %284, %494 : vector<8x128xf32>
    %496 = arith.addf %493, %495 : vector<8x128xf32>
    %497 = vector.broadcast %87 : f32 to vector<8x128xf32>
    %498 = arith.mulf %298, %497 : vector<8x128xf32>
    %499 = arith.addf %496, %498 : vector<8x128xf32>
    %500 = vector.broadcast %88 : f32 to vector<8x128xf32>
    %501 = arith.mulf %312, %500 : vector<8x128xf32>
    %502 = arith.addf %499, %501 : vector<8x128xf32>
    %503 = vector.broadcast %89 : f32 to vector<8x128xf32>
    %504 = arith.mulf %326, %503 : vector<8x128xf32>
    %505 = arith.addf %502, %504 : vector<8x128xf32>
    %506 = vector.broadcast %90 : f32 to vector<8x128xf32>
    %507 = arith.mulf %340, %506 : vector<8x128xf32>
    %508 = arith.addf %505, %507 : vector<8x128xf32>
    %509 = vector.broadcast %91 : f32 to vector<8x128xf32>
    %510 = arith.mulf %354, %509 : vector<8x128xf32>
    %511 = arith.addf %508, %510 : vector<8x128xf32>
    %512 = vector.broadcast %92 : f32 to vector<8x128xf32>
    %513 = arith.mulf %368, %512 : vector<8x128xf32>
    %514 = arith.addf %511, %513 : vector<8x128xf32>
    %515 = vector.broadcast %93 : f32 to vector<8x128xf32>
    %516 = arith.mulf %382, %515 : vector<8x128xf32>
    %517 = arith.addf %514, %516 : vector<8x128xf32>
    %518 = vector.broadcast %94 : f32 to vector<8x128xf32>
    %519 = arith.mulf %396, %518 : vector<8x128xf32>
    %520 = arith.addf %517, %519 : vector<8x128xf32>
    %521 = vector.broadcast %95 : f32 to vector<8x128xf32>
    %522 = arith.mulf %410, %521 : vector<8x128xf32>
    %523 = arith.addf %520, %522 : vector<8x128xf32>
    %524 = math.tanh %523 : vector<8x128xf32>
    %525 = vector.broadcast %96 : f32 to vector<8x128xf32>
    %526 = arith.mulf %256, %525 : vector<8x128xf32>
    %527 = vector.broadcast %207 : f32 to vector<8x128xf32>
    %528 = arith.addf %526, %527 : vector<8x128xf32>
    %529 = vector.broadcast %97 : f32 to vector<8x128xf32>
    %530 = arith.mulf %270, %529 : vector<8x128xf32>
    %531 = arith.addf %528, %530 : vector<8x128xf32>
    %532 = vector.broadcast %98 : f32 to vector<8x128xf32>
    %533 = arith.mulf %284, %532 : vector<8x128xf32>
    %534 = arith.addf %531, %533 : vector<8x128xf32>
    %535 = vector.broadcast %99 : f32 to vector<8x128xf32>
    %536 = arith.mulf %298, %535 : vector<8x128xf32>
    %537 = arith.addf %534, %536 : vector<8x128xf32>
    %538 = vector.broadcast %100 : f32 to vector<8x128xf32>
    %539 = arith.mulf %312, %538 : vector<8x128xf32>
    %540 = arith.addf %537, %539 : vector<8x128xf32>
    %541 = vector.broadcast %101 : f32 to vector<8x128xf32>
    %542 = arith.mulf %326, %541 : vector<8x128xf32>
    %543 = arith.addf %540, %542 : vector<8x128xf32>
    %544 = vector.broadcast %102 : f32 to vector<8x128xf32>
    %545 = arith.mulf %340, %544 : vector<8x128xf32>
    %546 = arith.addf %543, %545 : vector<8x128xf32>
    %547 = vector.broadcast %103 : f32 to vector<8x128xf32>
    %548 = arith.mulf %354, %547 : vector<8x128xf32>
    %549 = arith.addf %546, %548 : vector<8x128xf32>
    %550 = vector.broadcast %104 : f32 to vector<8x128xf32>
    %551 = arith.mulf %368, %550 : vector<8x128xf32>
    %552 = arith.addf %549, %551 : vector<8x128xf32>
    %553 = vector.broadcast %105 : f32 to vector<8x128xf32>
    %554 = arith.mulf %382, %553 : vector<8x128xf32>
    %555 = arith.addf %552, %554 : vector<8x128xf32>
    %556 = vector.broadcast %106 : f32 to vector<8x128xf32>
    %557 = arith.mulf %396, %556 : vector<8x128xf32>
    %558 = arith.addf %555, %557 : vector<8x128xf32>
    %559 = vector.broadcast %107 : f32 to vector<8x128xf32>
    %560 = arith.mulf %410, %559 : vector<8x128xf32>
    %561 = arith.addf %558, %560 : vector<8x128xf32>
    %562 = math.tanh %561 : vector<8x128xf32>
    %563 = vector.broadcast %108 : f32 to vector<8x128xf32>
    %564 = arith.mulf %256, %563 : vector<8x128xf32>
    %565 = vector.broadcast %208 : f32 to vector<8x128xf32>
    %566 = arith.addf %564, %565 : vector<8x128xf32>
    %567 = vector.broadcast %109 : f32 to vector<8x128xf32>
    %568 = arith.mulf %270, %567 : vector<8x128xf32>
    %569 = arith.addf %566, %568 : vector<8x128xf32>
    %570 = vector.broadcast %110 : f32 to vector<8x128xf32>
    %571 = arith.mulf %284, %570 : vector<8x128xf32>
    %572 = arith.addf %569, %571 : vector<8x128xf32>
    %573 = vector.broadcast %111 : f32 to vector<8x128xf32>
    %574 = arith.mulf %298, %573 : vector<8x128xf32>
    %575 = arith.addf %572, %574 : vector<8x128xf32>
    %576 = vector.broadcast %112 : f32 to vector<8x128xf32>
    %577 = arith.mulf %312, %576 : vector<8x128xf32>
    %578 = arith.addf %575, %577 : vector<8x128xf32>
    %579 = vector.broadcast %113 : f32 to vector<8x128xf32>
    %580 = arith.mulf %326, %579 : vector<8x128xf32>
    %581 = arith.addf %578, %580 : vector<8x128xf32>
    %582 = vector.broadcast %114 : f32 to vector<8x128xf32>
    %583 = arith.mulf %340, %582 : vector<8x128xf32>
    %584 = arith.addf %581, %583 : vector<8x128xf32>
    %585 = vector.broadcast %115 : f32 to vector<8x128xf32>
    %586 = arith.mulf %354, %585 : vector<8x128xf32>
    %587 = arith.addf %584, %586 : vector<8x128xf32>
    %588 = vector.broadcast %116 : f32 to vector<8x128xf32>
    %589 = arith.mulf %368, %588 : vector<8x128xf32>
    %590 = arith.addf %587, %589 : vector<8x128xf32>
    %591 = vector.broadcast %117 : f32 to vector<8x128xf32>
    %592 = arith.mulf %382, %591 : vector<8x128xf32>
    %593 = arith.addf %590, %592 : vector<8x128xf32>
    %594 = vector.broadcast %118 : f32 to vector<8x128xf32>
    %595 = arith.mulf %396, %594 : vector<8x128xf32>
    %596 = arith.addf %593, %595 : vector<8x128xf32>
    %597 = vector.broadcast %119 : f32 to vector<8x128xf32>
    %598 = arith.mulf %410, %597 : vector<8x128xf32>
    %599 = arith.addf %596, %598 : vector<8x128xf32>
    %600 = math.tanh %599 : vector<8x128xf32>
    %601 = vector.broadcast %120 : f32 to vector<8x128xf32>
    %602 = arith.mulf %256, %601 : vector<8x128xf32>
    %603 = vector.broadcast %209 : f32 to vector<8x128xf32>
    %604 = arith.addf %602, %603 : vector<8x128xf32>
    %605 = vector.broadcast %121 : f32 to vector<8x128xf32>
    %606 = arith.mulf %270, %605 : vector<8x128xf32>
    %607 = arith.addf %604, %606 : vector<8x128xf32>
    %608 = vector.broadcast %122 : f32 to vector<8x128xf32>
    %609 = arith.mulf %284, %608 : vector<8x128xf32>
    %610 = arith.addf %607, %609 : vector<8x128xf32>
    %611 = vector.broadcast %123 : f32 to vector<8x128xf32>
    %612 = arith.mulf %298, %611 : vector<8x128xf32>
    %613 = arith.addf %610, %612 : vector<8x128xf32>
    %614 = vector.broadcast %124 : f32 to vector<8x128xf32>
    %615 = arith.mulf %312, %614 : vector<8x128xf32>
    %616 = arith.addf %613, %615 : vector<8x128xf32>
    %617 = vector.broadcast %125 : f32 to vector<8x128xf32>
    %618 = arith.mulf %326, %617 : vector<8x128xf32>
    %619 = arith.addf %616, %618 : vector<8x128xf32>
    %620 = vector.broadcast %126 : f32 to vector<8x128xf32>
    %621 = arith.mulf %340, %620 : vector<8x128xf32>
    %622 = arith.addf %619, %621 : vector<8x128xf32>
    %623 = vector.broadcast %127 : f32 to vector<8x128xf32>
    %624 = arith.mulf %354, %623 : vector<8x128xf32>
    %625 = arith.addf %622, %624 : vector<8x128xf32>
    %626 = vector.broadcast %128 : f32 to vector<8x128xf32>
    %627 = arith.mulf %368, %626 : vector<8x128xf32>
    %628 = arith.addf %625, %627 : vector<8x128xf32>
    %629 = vector.broadcast %129 : f32 to vector<8x128xf32>
    %630 = arith.mulf %382, %629 : vector<8x128xf32>
    %631 = arith.addf %628, %630 : vector<8x128xf32>
    %632 = vector.broadcast %130 : f32 to vector<8x128xf32>
    %633 = arith.mulf %396, %632 : vector<8x128xf32>
    %634 = arith.addf %631, %633 : vector<8x128xf32>
    %635 = vector.broadcast %131 : f32 to vector<8x128xf32>
    %636 = arith.mulf %410, %635 : vector<8x128xf32>
    %637 = arith.addf %634, %636 : vector<8x128xf32>
    %638 = math.tanh %637 : vector<8x128xf32>
    %639 = vector.broadcast %132 : f32 to vector<8x128xf32>
    %640 = arith.mulf %256, %639 : vector<8x128xf32>
    %641 = vector.broadcast %210 : f32 to vector<8x128xf32>
    %642 = arith.addf %640, %641 : vector<8x128xf32>
    %643 = vector.broadcast %133 : f32 to vector<8x128xf32>
    %644 = arith.mulf %270, %643 : vector<8x128xf32>
    %645 = arith.addf %642, %644 : vector<8x128xf32>
    %646 = vector.broadcast %134 : f32 to vector<8x128xf32>
    %647 = arith.mulf %284, %646 : vector<8x128xf32>
    %648 = arith.addf %645, %647 : vector<8x128xf32>
    %649 = vector.broadcast %135 : f32 to vector<8x128xf32>
    %650 = arith.mulf %298, %649 : vector<8x128xf32>
    %651 = arith.addf %648, %650 : vector<8x128xf32>
    %652 = vector.broadcast %136 : f32 to vector<8x128xf32>
    %653 = arith.mulf %312, %652 : vector<8x128xf32>
    %654 = arith.addf %651, %653 : vector<8x128xf32>
    %655 = vector.broadcast %137 : f32 to vector<8x128xf32>
    %656 = arith.mulf %326, %655 : vector<8x128xf32>
    %657 = arith.addf %654, %656 : vector<8x128xf32>
    %658 = vector.broadcast %138 : f32 to vector<8x128xf32>
    %659 = arith.mulf %340, %658 : vector<8x128xf32>
    %660 = arith.addf %657, %659 : vector<8x128xf32>
    %661 = vector.broadcast %139 : f32 to vector<8x128xf32>
    %662 = arith.mulf %354, %661 : vector<8x128xf32>
    %663 = arith.addf %660, %662 : vector<8x128xf32>
    %664 = vector.broadcast %140 : f32 to vector<8x128xf32>
    %665 = arith.mulf %368, %664 : vector<8x128xf32>
    %666 = arith.addf %663, %665 : vector<8x128xf32>
    %667 = vector.broadcast %141 : f32 to vector<8x128xf32>
    %668 = arith.mulf %382, %667 : vector<8x128xf32>
    %669 = arith.addf %666, %668 : vector<8x128xf32>
    %670 = vector.broadcast %142 : f32 to vector<8x128xf32>
    %671 = arith.mulf %396, %670 : vector<8x128xf32>
    %672 = arith.addf %669, %671 : vector<8x128xf32>
    %673 = vector.broadcast %143 : f32 to vector<8x128xf32>
    %674 = arith.mulf %410, %673 : vector<8x128xf32>
    %675 = arith.addf %672, %674 : vector<8x128xf32>
    %676 = math.tanh %675 : vector<8x128xf32>
    %677 = vector.broadcast %144 : f32 to vector<8x128xf32>
    %678 = arith.mulf %256, %677 : vector<8x128xf32>
    %679 = vector.broadcast %211 : f32 to vector<8x128xf32>
    %680 = arith.addf %678, %679 : vector<8x128xf32>
    %681 = vector.broadcast %145 : f32 to vector<8x128xf32>
    %682 = arith.mulf %270, %681 : vector<8x128xf32>
    %683 = arith.addf %680, %682 : vector<8x128xf32>
    %684 = vector.broadcast %146 : f32 to vector<8x128xf32>
    %685 = arith.mulf %284, %684 : vector<8x128xf32>
    %686 = arith.addf %683, %685 : vector<8x128xf32>
    %687 = vector.broadcast %147 : f32 to vector<8x128xf32>
    %688 = arith.mulf %298, %687 : vector<8x128xf32>
    %689 = arith.addf %686, %688 : vector<8x128xf32>
    %690 = vector.broadcast %148 : f32 to vector<8x128xf32>
    %691 = arith.mulf %312, %690 : vector<8x128xf32>
    %692 = arith.addf %689, %691 : vector<8x128xf32>
    %693 = vector.broadcast %149 : f32 to vector<8x128xf32>
    %694 = arith.mulf %326, %693 : vector<8x128xf32>
    %695 = arith.addf %692, %694 : vector<8x128xf32>
    %696 = vector.broadcast %150 : f32 to vector<8x128xf32>
    %697 = arith.mulf %340, %696 : vector<8x128xf32>
    %698 = arith.addf %695, %697 : vector<8x128xf32>
    %699 = vector.broadcast %151 : f32 to vector<8x128xf32>
    %700 = arith.mulf %354, %699 : vector<8x128xf32>
    %701 = arith.addf %698, %700 : vector<8x128xf32>
    %702 = vector.broadcast %152 : f32 to vector<8x128xf32>
    %703 = arith.mulf %368, %702 : vector<8x128xf32>
    %704 = arith.addf %701, %703 : vector<8x128xf32>
    %705 = vector.broadcast %153 : f32 to vector<8x128xf32>
    %706 = arith.mulf %382, %705 : vector<8x128xf32>
    %707 = arith.addf %704, %706 : vector<8x128xf32>
    %708 = vector.broadcast %154 : f32 to vector<8x128xf32>
    %709 = arith.mulf %396, %708 : vector<8x128xf32>
    %710 = arith.addf %707, %709 : vector<8x128xf32>
    %711 = vector.broadcast %155 : f32 to vector<8x128xf32>
    %712 = arith.mulf %410, %711 : vector<8x128xf32>
    %713 = arith.addf %710, %712 : vector<8x128xf32>
    %714 = math.tanh %713 : vector<8x128xf32>
    %715 = vector.broadcast %156 : f32 to vector<8x128xf32>
    %716 = arith.mulf %256, %715 : vector<8x128xf32>
    %717 = vector.broadcast %212 : f32 to vector<8x128xf32>
    %718 = arith.addf %716, %717 : vector<8x128xf32>
    %719 = vector.broadcast %157 : f32 to vector<8x128xf32>
    %720 = arith.mulf %270, %719 : vector<8x128xf32>
    %721 = arith.addf %718, %720 : vector<8x128xf32>
    %722 = vector.broadcast %158 : f32 to vector<8x128xf32>
    %723 = arith.mulf %284, %722 : vector<8x128xf32>
    %724 = arith.addf %721, %723 : vector<8x128xf32>
    %725 = vector.broadcast %159 : f32 to vector<8x128xf32>
    %726 = arith.mulf %298, %725 : vector<8x128xf32>
    %727 = arith.addf %724, %726 : vector<8x128xf32>
    %728 = vector.broadcast %160 : f32 to vector<8x128xf32>
    %729 = arith.mulf %312, %728 : vector<8x128xf32>
    %730 = arith.addf %727, %729 : vector<8x128xf32>
    %731 = vector.broadcast %161 : f32 to vector<8x128xf32>
    %732 = arith.mulf %326, %731 : vector<8x128xf32>
    %733 = arith.addf %730, %732 : vector<8x128xf32>
    %734 = vector.broadcast %162 : f32 to vector<8x128xf32>
    %735 = arith.mulf %340, %734 : vector<8x128xf32>
    %736 = arith.addf %733, %735 : vector<8x128xf32>
    %737 = vector.broadcast %163 : f32 to vector<8x128xf32>
    %738 = arith.mulf %354, %737 : vector<8x128xf32>
    %739 = arith.addf %736, %738 : vector<8x128xf32>
    %740 = vector.broadcast %164 : f32 to vector<8x128xf32>
    %741 = arith.mulf %368, %740 : vector<8x128xf32>
    %742 = arith.addf %739, %741 : vector<8x128xf32>
    %743 = vector.broadcast %165 : f32 to vector<8x128xf32>
    %744 = arith.mulf %382, %743 : vector<8x128xf32>
    %745 = arith.addf %742, %744 : vector<8x128xf32>
    %746 = vector.broadcast %166 : f32 to vector<8x128xf32>
    %747 = arith.mulf %396, %746 : vector<8x128xf32>
    %748 = arith.addf %745, %747 : vector<8x128xf32>
    %749 = vector.broadcast %167 : f32 to vector<8x128xf32>
    %750 = arith.mulf %410, %749 : vector<8x128xf32>
    %751 = arith.addf %748, %750 : vector<8x128xf32>
    %752 = math.tanh %751 : vector<8x128xf32>
    %753 = vector.broadcast %168 : f32 to vector<8x128xf32>
    %754 = arith.mulf %256, %753 : vector<8x128xf32>
    %755 = vector.broadcast %213 : f32 to vector<8x128xf32>
    %756 = arith.addf %754, %755 : vector<8x128xf32>
    %757 = vector.broadcast %169 : f32 to vector<8x128xf32>
    %758 = arith.mulf %270, %757 : vector<8x128xf32>
    %759 = arith.addf %756, %758 : vector<8x128xf32>
    %760 = vector.broadcast %170 : f32 to vector<8x128xf32>
    %761 = arith.mulf %284, %760 : vector<8x128xf32>
    %762 = arith.addf %759, %761 : vector<8x128xf32>
    %763 = vector.broadcast %171 : f32 to vector<8x128xf32>
    %764 = arith.mulf %298, %763 : vector<8x128xf32>
    %765 = arith.addf %762, %764 : vector<8x128xf32>
    %766 = vector.broadcast %172 : f32 to vector<8x128xf32>
    %767 = arith.mulf %312, %766 : vector<8x128xf32>
    %768 = arith.addf %765, %767 : vector<8x128xf32>
    %769 = vector.broadcast %173 : f32 to vector<8x128xf32>
    %770 = arith.mulf %326, %769 : vector<8x128xf32>
    %771 = arith.addf %768, %770 : vector<8x128xf32>
    %772 = vector.broadcast %174 : f32 to vector<8x128xf32>
    %773 = arith.mulf %340, %772 : vector<8x128xf32>
    %774 = arith.addf %771, %773 : vector<8x128xf32>
    %775 = vector.broadcast %175 : f32 to vector<8x128xf32>
    %776 = arith.mulf %354, %775 : vector<8x128xf32>
    %777 = arith.addf %774, %776 : vector<8x128xf32>
    %778 = vector.broadcast %176 : f32 to vector<8x128xf32>
    %779 = arith.mulf %368, %778 : vector<8x128xf32>
    %780 = arith.addf %777, %779 : vector<8x128xf32>
    %781 = vector.broadcast %177 : f32 to vector<8x128xf32>
    %782 = arith.mulf %382, %781 : vector<8x128xf32>
    %783 = arith.addf %780, %782 : vector<8x128xf32>
    %784 = vector.broadcast %178 : f32 to vector<8x128xf32>
    %785 = arith.mulf %396, %784 : vector<8x128xf32>
    %786 = arith.addf %783, %785 : vector<8x128xf32>
    %787 = vector.broadcast %179 : f32 to vector<8x128xf32>
    %788 = arith.mulf %410, %787 : vector<8x128xf32>
    %789 = arith.addf %786, %788 : vector<8x128xf32>
    %790 = math.tanh %789 : vector<8x128xf32>
    %791 = vector.broadcast %180 : f32 to vector<8x128xf32>
    %792 = arith.mulf %256, %791 : vector<8x128xf32>
    %793 = vector.broadcast %214 : f32 to vector<8x128xf32>
    %794 = arith.addf %792, %793 : vector<8x128xf32>
    %795 = vector.broadcast %181 : f32 to vector<8x128xf32>
    %796 = arith.mulf %270, %795 : vector<8x128xf32>
    %797 = arith.addf %794, %796 : vector<8x128xf32>
    %798 = vector.broadcast %182 : f32 to vector<8x128xf32>
    %799 = arith.mulf %284, %798 : vector<8x128xf32>
    %800 = arith.addf %797, %799 : vector<8x128xf32>
    %801 = vector.broadcast %183 : f32 to vector<8x128xf32>
    %802 = arith.mulf %298, %801 : vector<8x128xf32>
    %803 = arith.addf %800, %802 : vector<8x128xf32>
    %804 = vector.broadcast %184 : f32 to vector<8x128xf32>
    %805 = arith.mulf %312, %804 : vector<8x128xf32>
    %806 = arith.addf %803, %805 : vector<8x128xf32>
    %807 = vector.broadcast %185 : f32 to vector<8x128xf32>
    %808 = arith.mulf %326, %807 : vector<8x128xf32>
    %809 = arith.addf %806, %808 : vector<8x128xf32>
    %810 = vector.broadcast %186 : f32 to vector<8x128xf32>
    %811 = arith.mulf %340, %810 : vector<8x128xf32>
    %812 = arith.addf %809, %811 : vector<8x128xf32>
    %813 = vector.broadcast %187 : f32 to vector<8x128xf32>
    %814 = arith.mulf %354, %813 : vector<8x128xf32>
    %815 = arith.addf %812, %814 : vector<8x128xf32>
    %816 = vector.broadcast %188 : f32 to vector<8x128xf32>
    %817 = arith.mulf %368, %816 : vector<8x128xf32>
    %818 = arith.addf %815, %817 : vector<8x128xf32>
    %819 = vector.broadcast %189 : f32 to vector<8x128xf32>
    %820 = arith.mulf %382, %819 : vector<8x128xf32>
    %821 = arith.addf %818, %820 : vector<8x128xf32>
    %822 = vector.broadcast %190 : f32 to vector<8x128xf32>
    %823 = arith.mulf %396, %822 : vector<8x128xf32>
    %824 = arith.addf %821, %823 : vector<8x128xf32>
    %825 = vector.broadcast %191 : f32 to vector<8x128xf32>
    %826 = arith.mulf %410, %825 : vector<8x128xf32>
    %827 = arith.addf %824, %826 : vector<8x128xf32>
    %828 = math.tanh %827 : vector<8x128xf32>
    %829 = vector.broadcast %192 : f32 to vector<8x128xf32>
    %830 = arith.mulf %256, %829 : vector<8x128xf32>
    %831 = vector.broadcast %215 : f32 to vector<8x128xf32>
    %832 = arith.addf %830, %831 : vector<8x128xf32>
    %833 = vector.broadcast %193 : f32 to vector<8x128xf32>
    %834 = arith.mulf %270, %833 : vector<8x128xf32>
    %835 = arith.addf %832, %834 : vector<8x128xf32>
    %836 = vector.broadcast %194 : f32 to vector<8x128xf32>
    %837 = arith.mulf %284, %836 : vector<8x128xf32>
    %838 = arith.addf %835, %837 : vector<8x128xf32>
    %839 = vector.broadcast %195 : f32 to vector<8x128xf32>
    %840 = arith.mulf %298, %839 : vector<8x128xf32>
    %841 = arith.addf %838, %840 : vector<8x128xf32>
    %842 = vector.broadcast %196 : f32 to vector<8x128xf32>
    %843 = arith.mulf %312, %842 : vector<8x128xf32>
    %844 = arith.addf %841, %843 : vector<8x128xf32>
    %845 = vector.broadcast %197 : f32 to vector<8x128xf32>
    %846 = arith.mulf %326, %845 : vector<8x128xf32>
    %847 = arith.addf %844, %846 : vector<8x128xf32>
    %848 = vector.broadcast %198 : f32 to vector<8x128xf32>
    %849 = arith.mulf %340, %848 : vector<8x128xf32>
    %850 = arith.addf %847, %849 : vector<8x128xf32>
    %851 = vector.broadcast %199 : f32 to vector<8x128xf32>
    %852 = arith.mulf %354, %851 : vector<8x128xf32>
    %853 = arith.addf %850, %852 : vector<8x128xf32>
    %854 = vector.broadcast %200 : f32 to vector<8x128xf32>
    %855 = arith.mulf %368, %854 : vector<8x128xf32>
    %856 = arith.addf %853, %855 : vector<8x128xf32>
    %857 = vector.broadcast %201 : f32 to vector<8x128xf32>
    %858 = arith.mulf %382, %857 : vector<8x128xf32>
    %859 = arith.addf %856, %858 : vector<8x128xf32>
    %860 = vector.broadcast %202 : f32 to vector<8x128xf32>
    %861 = arith.mulf %396, %860 : vector<8x128xf32>
    %862 = arith.addf %859, %861 : vector<8x128xf32>
    %863 = vector.broadcast %203 : f32 to vector<8x128xf32>
    %864 = arith.mulf %410, %863 : vector<8x128xf32>
    %865 = arith.addf %862, %864 : vector<8x128xf32>
    %866 = math.tanh %865 : vector<8x128xf32>
    %867 = vector.broadcast %216 : f32 to vector<8x128xf32>
    %868 = arith.mulf %448, %867 : vector<8x128xf32>
    %869 = vector.broadcast %228 : f32 to vector<8x128xf32>
    %870 = arith.addf %868, %869 : vector<8x128xf32>
    %871 = vector.broadcast %217 : f32 to vector<8x128xf32>
    %872 = arith.mulf %486, %871 : vector<8x128xf32>
    %873 = arith.addf %870, %872 : vector<8x128xf32>
    %874 = vector.broadcast %218 : f32 to vector<8x128xf32>
    %875 = arith.mulf %524, %874 : vector<8x128xf32>
    %876 = arith.addf %873, %875 : vector<8x128xf32>
    %877 = vector.broadcast %219 : f32 to vector<8x128xf32>
    %878 = arith.mulf %562, %877 : vector<8x128xf32>
    %879 = arith.addf %876, %878 : vector<8x128xf32>
    %880 = vector.broadcast %220 : f32 to vector<8x128xf32>
    %881 = arith.mulf %600, %880 : vector<8x128xf32>
    %882 = arith.addf %879, %881 : vector<8x128xf32>
    %883 = vector.broadcast %221 : f32 to vector<8x128xf32>
    %884 = arith.mulf %638, %883 : vector<8x128xf32>
    %885 = arith.addf %882, %884 : vector<8x128xf32>
    %886 = vector.broadcast %222 : f32 to vector<8x128xf32>
    %887 = arith.mulf %676, %886 : vector<8x128xf32>
    %888 = arith.addf %885, %887 : vector<8x128xf32>
    %889 = vector.broadcast %223 : f32 to vector<8x128xf32>
    %890 = arith.mulf %714, %889 : vector<8x128xf32>
    %891 = arith.addf %888, %890 : vector<8x128xf32>
    %892 = vector.broadcast %224 : f32 to vector<8x128xf32>
    %893 = arith.mulf %752, %892 : vector<8x128xf32>
    %894 = arith.addf %891, %893 : vector<8x128xf32>
    %895 = vector.broadcast %225 : f32 to vector<8x128xf32>
    %896 = arith.mulf %790, %895 : vector<8x128xf32>
    %897 = arith.addf %894, %896 : vector<8x128xf32>
    %898 = vector.broadcast %226 : f32 to vector<8x128xf32>
    %899 = arith.mulf %828, %898 : vector<8x128xf32>
    %900 = arith.addf %897, %899 : vector<8x128xf32>
    %901 = vector.broadcast %227 : f32 to vector<8x128xf32>
    %902 = arith.mulf %866, %901 : vector<8x128xf32>
    %903 = arith.addf %900, %902 : vector<8x128xf32>
    %904 = arith.index_cast %230 : i32 to index
    %c0_8 = arith.constant 0 : index
    %905 = vector.load %arg3[%904, %c0_8] : memref<8x128xf32, #tpu.memory_space<vmem>>, vector<8x128xf32>
    tpu.vector_store %arg3[%904, %c0_8], %903 {strides = array<i32>} : memref<8x128xf32, #tpu.memory_space<vmem>>, vector<8x128xf32>,
    %c1_i32 = arith.constant 1 : i32
    return
  }
  func.func @transform_0(%arg0: i32) -> i32 {
    %c0_i32 = arith.constant 0 : i32
    %c0_i32_0 = arith.constant 0 : i32
    return %c0_i32 : i32
  }
  func.func @transform_1(%arg0: i32) -> (i32, i32, i32) {
    %c0_i32 = arith.constant 0 : i32
    %c0_i32_0 = arith.constant 0 : i32
    %c0_i32_1 = arith.constant 0 : i32
    return %c0_i32, %arg0, %c0_i32_0 : i32, i32, i32
  }
  func.func @transform_2(%arg0: i32) -> (i32, i32) {
    %c0_i32 = arith.constant 0 : i32
    %c0_i32_0 = arith.constant 0 : i32
    return %arg0, %c0_i32 : i32, i32
  }
}

</mosaic_0001>

<bundles_post_ra>
// kernel: tpu_custom_call.1
= control target key start
LH: loop header
LB: loop body
LE: loop exit
PB: predicated region body
PF: predicated region fallthrough
CT: control target
= control target key end

     0   :  { %7 = vsyncpa [#allocation5], 0  ;;  %s2789_s0 = inlined_call_operand.hbm [shape: f32[229], index: 0, kind: input, shape index: {}]   ;;  %s2790_s1 = inlined_call_operand.hbm [shape: f32[4,8,128], index: 1, kind: input, shape index: {}]   ;;  %s2791_s2 = inlined_call_operand.hbm [shape: f32[8,128], index: 2, kind: output, shape index: {}]  }
   0x1   :  { %8 = vsyncpa [#allocation3], 0 }
   0x2   :  { %9 = vsyncpa [#allocation4], 0  ;;  %s1238_s11 = scalar_lea.hbm %s2789_s0, 32 }
   0x3   :  { %p1239_p0 = scmp.ne.s32.totalorder %s2789_s0, %s1238_s11  ;;  %p1242_p1 = scmp.lt.u32.totalorder %s1238_s11, %s2789_s0 }
   0x5   :  { %p1244_p2 = pnand %p1242_p1, %p1239_p0 }
   0x7   :  { %1247 = shalt.err (!%p1244_p2)
}
   0x8   :  { %s1298_s16 = smov [#allocation2]   ;;  %s1299_s19 = smov [#allocation6]  }
   0x9   :  { %17 = dma.hbm_to_smem %s2789_s0, 32, %s1298_s16, [#allocation5]  }
   0xa   :  { %s23_s20 = sshll.u32 %s1299_s19, 4  ;;  %s1248_s23 = scalar_lea.hbm %s2790_s1, 512  ;;  %s24_s20 = int_to_ptr.vmem [resolvable:$true] %s23_s20 }
   0xb   :  { %p1249_p3 = scmp.ne.s32.totalorder %s2790_s1, %s1248_s23  ;;  %p1252_p4 = scmp.lt.u32.totalorder %s1248_s23, %s2790_s1 }
   0xd   :  { %p1254_p5 = pnand %p1252_p4, %p1249_p3 }
   0xf   :  { %1257 = shalt.err (!%p1254_p5)
}
  0x10   :  { %s1258_s28 = scalar_lea.vmem %s24_s20, 512  ;;  %p1263_p7 = scmp.lt.s32.totalorder %s24_s20, %s24_s20 }
  0x11   :  { %p1259_p6 = scmp.ne.s32.totalorder %s24_s20, %s1258_s28  ;;  %p1264_p8 = scmp.lt.s32.totalorder %s1258_s28, %s1258_s28 }
  0x13   :  { %p1265_p9 = por %p1264_p8, %p1263_p7 }
  0x15   :  { %p1266_p10 = pnand %p1265_p9, %p1259_p6 }
  0x17   :  { %1269 = shalt.err (!%p1266_p10)
}
  0x18   :  { %s1300_s0 = smov 128   ;;  %s1301_s29 = smov 8  }
  0x19   :  { %29 = dma.hbm_to_vmem [thread:$0]  %s2790_s1, 512, %s24_s20, [#allocation3], %s1300_s0, %s1300_s0, %s1301_s29  }
  0x1a   :  { %1292 = dma.done.wait [#allocation5], 32  }
  0x1b   :  { %1293 = vsyncadd [#allocation5], 4294967264 }
  0x1c   :  { %1294 = dma.done.wait [#allocation3], 512  }
  0x1d   :  { %1295 = vsyncadd [#allocation3], 4294966784 }
  0x1e   :  { %36 = sfence }
  0x1f   :  { %s37_s4 = sld [smem:[#allocation2]]  ;;  %s957_s5 = sld [smem:[#allocation2 + $0x1]]  ;;  %v1358_v0 = vld [vmem:[#allocation6] sm:$0xff]  ;;  %v1360_v1 = vld [vmem:[#allocation6 + $0x8] sm:$0xff]  ;;  %v1366_v2 = vld [vmem:[#allocation6 + $0x10] sm:$0xff] }
  0x20   :  { %s958_s6 = sld [smem:[#allocation2 + $0x2]]  ;;  %s959_s7 = sld [smem:[#allocation2 + $0x3]]  ;;  %v1368_v3 = vld [vmem:[#allocation6 + $0x18] sm:$0xff] }
  0x21   :  { %s1342_s8 = sld [smem:[#allocation2 + $0x4]]  ;;  %s1344_s9 = sld [smem:[#allocation2 + $0x5]] }
  0x22   :  { %s1346_s10 = sld [smem:[#allocation2 + $0x6]]  ;;  %s1348_s11 = sld [smem:[#allocation2 + $0x7]] }
  0x23   :  { %s1350_s12 = sld [smem:[#allocation2 + $0x8]]  ;;  %s1352_s1 = sld [smem:[#allocation2 + $0x9]] }
  0x24   :  { %s1354_s13 = sld [smem:[#allocation2 + $0xa]]  ;;  %s1356_s14 = sld [smem:[#allocation2 + $0xb]] }
  0x25   :  { %s1362_s15 = sld [smem:[#allocation2 + $0xc]]  ;;  %s1364_s16 = sld [smem:[#allocation2 + $0xd]]  ;;  %v276_v4 = vstv %s37_s4  ;;  %v280_v5 = vstv %s957_s5 }
  0x26   :  { %s1370_s17 = sld [smem:[#allocation2 + $0xe]]  ;;  %s1372_s18 = sld [smem:[#allocation2 + $0xf]]  ;;  %v283_v6 = vstv %s958_s6  ;;  %v286_v7 = vstv %s959_s7  ;;  %v1379_v8 = vmul.f32 %v276_v4, %v1358_v0  ;;  %v1382_v9 = vmul.f32 %v280_v5, %v1360_v1 }
  0x27   :  { %s1374_s19 = sld [smem:[#allocation2 + $0x10]]  ;;  %s1376_s20 = sld [smem:[#allocation2 + $0x11]]  ;;  %v290_v10 = vstv %s1342_s8  ;;  %v294_v11 = vstv %s1344_s9  ;;  %v1391_v12 = vmul.f32 %v283_v6, %v1366_v2  ;;  %v1394_v13 = vmul.f32 %v286_v7, %v1368_v3 }
  0x28   :  { %s1386_s21 = sld [smem:[#allocation2 + $0x12]]  ;;  %s1388_s22 = sld [smem:[#allocation2 + $0x13]]  ;;  %v297_v14 = vstv %s1346_s10  ;;  %v300_v15 = vstv %s1348_s11  ;;  %v1403_v16 = vmul.f32 %v290_v10, %v1358_v0  ;;  %v1406_v17 = vmul.f32 %v294_v11, %v1360_v1 }
  0x29   :  { %s1398_s23 = sld [smem:[#allocation2 + $0x14]]  ;;  %s1400_s24 = sld [smem:[#allocation2 + $0x15]]  ;;  %v304_v18 = vstv %s1350_s12  ;;  %v308_v19 = vstv %s1352_s1  ;;  %v1415_v20 = vmul.f32 %v297_v14, %v1366_v2  ;;  %v1418_v21 = vmul.f32 %v300_v15, %v1368_v3 }
  0x2a   :  { %s1410_s25 = sld [smem:[#allocation2 + $0x16]]  ;;  %s1412_s26 = sld [smem:[#allocation2 + $0x17]]  ;;  %v311_v22 = vstv %s1354_s13  ;;  %v314_v23 = vstv %s1356_s14  ;;  %v1427_v24 = vmul.f32 %v304_v18, %v1358_v0  ;;  %v1430_v25 = vmul.f32 %v308_v19, %v1360_v1 }
  0x2b   :  { %s1422_s27 = sld [smem:[#allocation2 + $0x18]]  ;;  %s1424_s28 = sld [smem:[#allocation2 + $0x19]]  ;;  %v318_v26 = vstv %s1362_s15  ;;  %v322_v27 = vstv %s1364_s16  ;;  %v1439_v28 = vmul.f32 %v311_v22, %v1366_v2  ;;  %v1442_v29 = vmul.f32 %v314_v23, %v1368_v3 }
  0x2c   :  { %s1434_s0 = sld [smem:[#allocation2 + $0x1a]]  ;;  %s1436_s29 = sld [smem:[#allocation2 + $0x1b]]  ;;  %v325_v30 = vstv %s1370_s17  ;;  %v328_v31 = vstv %s1372_s18  ;;  %v1451_v32 = vmul.f32 %v318_v26, %v1358_v0  ;;  %v1454_v33 = vmul.f32 %v322_v27, %v1360_v1 }
  0x2d   :  { %s1446_s30 = sld [smem:[#allocation2 + $0x1c]]  ;;  %s1448_s3 = sld [smem:[#allocation2 + $0x1d]]  ;;  %v332_v34 = vstv %s1374_s19  ;;  %v336_v35 = vstv %s1376_s20  ;;  %v1463_v36 = vmul.f32 %v325_v30, %v1366_v2  ;;  %v1466_v37 = vmul.f32 %v328_v31, %v1368_v3 }
  0x2e   :  { %s1458_s4 = sld [smem:[#allocation2 + $0x1e]]  ;;  %s1460_s5 = sld [smem:[#allocation2 + $0x1f]]  ;;  %v339_v38 = vstv %s1386_s21  ;;  %v342_v39 = vstv %s1388_s22  ;;  %v1475_v40 = vmul.f32 %v332_v34, %v1358_v0  ;;  %v1478_v41 = vmul.f32 %v336_v35, %v1360_v1 }
  0x2f   :  { %s1470_s6 = sld [smem:[#allocation2 + $0x20]]  ;;  %s1472_s7 = sld [smem:[#allocation2 + $0x21]]  ;;  %v346_v42 = vstv %s1398_s23  ;;  %v350_v43 = vstv %s1400_s24  ;;  %v1487_v44 = vmul.f32 %v339_v38, %v1366_v2  ;;  %v1490_v45 = vmul.f32 %v342_v39, %v1368_v3 }
  0x30   :  { %s1482_s8 = sld [smem:[#allocation2 + $0x22]]  ;;  %s1484_s9 = sld [smem:[#allocation2 + $0x23]]  ;;  %v353_v46 = vstv %s1410_s25  ;;  %v356_v47 = vstv %s1412_s26  ;;  %v1499_v48 = vmul.f32 %v346_v42, %v1358_v0  ;;  %v1502_v49 = vmul.f32 %v350_v43, %v1360_v1 }
  0x31   :  { %s1494_s10 = sld [smem:[#allocation2 + $0x24]]  ;;  %s1496_s11 = sld [smem:[#allocation2 + $0x25]]  ;;  %v360_v50 = vstv %s1422_s27  ;;  %v364_v51 = vstv %s1424_s28  ;;  %v1511_v52 = vmul.f32 %v353_v46, %v1366_v2  ;;  %v1514_v53 = vmul.f32 %v356_v47, %v1368_v3 }
  0x32   :  { %s1506_s12 = sld [smem:[#allocation2 + $0x26]]  ;;  %s1508_s1 = sld [smem:[#allocation2 + $0x27]]  ;;  %v367_v54 = vstv %s1434_s0  ;;  %v370_v55 = vstv %s1436_s29  ;;  %v1523_v56 = vmul.f32 %v360_v50, %v1358_v0  ;;  %v1526_v57 = vmul.f32 %v364_v51, %v1360_v1 }
  0x33   :  { %s1518_s13 = sld [smem:[#allocation2 + $0x28]]  ;;  %s1520_s14 = sld [smem:[#allocation2 + $0x29]]  ;;  %v374_v58 = vstv %s1446_s30  ;;  %v378_v59 = vstv %s1448_s3  ;;  %v1535_v60 = vmul.f32 %v367_v54, %v1366_v2  ;;  %v1538_v61 = vmul.f32 %v370_v55, %v1368_v3 }
  0x34   :  { %s1530_s15 = sld [smem:[#allocation2 + $0x2a]]  ;;  %s1532_s16 = sld [smem:[#allocation2 + $0x2b]]  ;;  %v381_v62 = vstv %s1458_s4  ;;  %v384_v63 = vstv %s1460_s5  ;;  %v1547_v4 = vmul.f32 %v374_v58, %v1358_v0  ;;  %v1550_v5 = vmul.f32 %v378_v59, %v1360_v1 }
  0x35   :  { %s1542_s17 = sld [smem:[#allocation2 + $0x2c]]  ;;  %s1544_s18 = sld [smem:[#allocation2 + $0x2d]]  ;;  %v388_v6 = vstv %s1470_s6  ;;  %v392_v7 = vstv %s1472_s7  ;;  %v1559_v10 = vmul.f32 %v381_v62, %v1366_v2  ;;  %v1562_v11 = vmul.f32 %v384_v63, %v1368_v3 }
  0x36   :  { %s1554_s19 = sld [smem:[#allocation2 + $0x2e]]  ;;  %s1556_s20 = sld [smem:[#allocation2 + $0x2f]]  ;;  %v395_v14 = vstv %s1482_s8  ;;  %v398_v15 = vstv %s1484_s9  ;;  %v1571_v18 = vmul.f32 %v388_v6, %v1358_v0  ;;  %v1574_v19 = vmul.f32 %v392_v7, %v1360_v1 }
  0x37   :  { %s1566_s21 = sld [smem:[#allocation2 + $0x30]]  ;;  %s1568_s22 = sld [smem:[#allocation2 + $0x31]]  ;;  %v402_v22 = vstv %s1494_s10  ;;  %v406_v23 = vstv %s1496_s11  ;;  %v1583_v26 = vmul.f32 %v395_v14, %v1366_v2  ;;  %v1586_v27 = vmul.f32 %v398_v15, %v1368_v3 }
  0x38   :  { %s1578_s23 = sld [smem:[#allocation2 + $0x32]]  ;;  %s1580_s24 = sld [smem:[#allocation2 + $0x33]]  ;;  %v409_v30 = vstv %s1506_s12  ;;  %v412_v31 = vstv %s1508_s1  ;;  %v1595_v34 = vmul.f32 %v402_v22, %v1358_v0  ;;  %v1598_v35 = vmul.f32 %v406_v23, %v1360_v1 }
  0x39   :  { %s1590_s25 = sld [smem:[#allocation2 + $0x34]]  ;;  %s1592_s26 = sld [smem:[#allocation2 + $0x35]]  ;;  %v416_v38 = vstv %s1518_s13  ;;  %v420_v39 = vstv %s1520_s14  ;;  %v1607_v42 = vmul.f32 %v409_v30, %v1366_v2  ;;  %v1610_v43 = vmul.f32 %v412_v31, %v1368_v3 }
  0x3a   :  { %s1602_s27 = sld [smem:[#allocation2 + $0x36]]  ;;  %s1604_s28 = sld [smem:[#allocation2 + $0x37]]  ;;  %v1613_v46 = vmul.f32 %v416_v38, %v1358_v0  ;;  %v423_v47 = vstv %s1530_s15  ;;  %v1617_v50 = vmul.f32 %v420_v39, %v1360_v1  ;;  %v426_v51 = vstv %s1532_s16 }
  0x3b   :  { %v430_v54 = vstv %s1542_s17  ;;  %v434_v55 = vstv %s1544_s18  ;;  %v1623_v58 = vmul.f32 %v423_v47, %v1366_v2  ;;  %s1638_s0 = sld [smem:[#allocation2 + $0x38]]  ;;  %s1644_s29 = sld [smem:[#allocation2 + $0x39]] }
  0x3c   :  { %v1626_v59 = vmul.f32 %v430_v54, %v1358_v0  ;;  %v1629_v62 = vmul.f32 %v434_v55, %v1360_v1  ;;  %v437_v63 = vstv %s1554_s19  ;;  %v440_v15 = vstv %s1556_s20  ;;  %s1650_s30 = sld [smem:[#allocation2 + $0x3a]]  ;;  %s1652_s3 = sld [smem:[#allocation2 + $0x3b]] }
  0x3d   :  { %v278_v6 = vstv %s1566_s21  ;;  %v292_v7 = vstv %s1568_s22  ;;  %v1635_v14 = vmul.f32 %v437_v63, %v1366_v2  ;;  %s1674_s4 = sld [smem:[#allocation2 + $0x3c]]  ;;  %s1676_s5 = sld [smem:[#allocation2 + $0x3d]] }
  0x3e   :  { %v279_v22 = vadd.f32 %v278_v6, %v1379_v8  ;;  %v293_v23 = vadd.f32 %v292_v7, %v1403_v16  ;;  %v306_v0 = vstv %s1578_s23  ;;  %v320_v30 = vstv %s1580_s24  ;;  %s1682_s6 = sld [smem:[#allocation2 + $0x3e]]  ;;  %s1684_s7 = sld [smem:[#allocation2 + $0x3f]] }
  0x3f   :  { %v307_v1 = vadd.f32 %v306_v0, %v1427_v24  ;;  %v321_v31 = vadd.f32 %v320_v30, %v1451_v32  ;;  %v334_v38 = vstv %s1590_s25  ;;  %v348_v2 = vstv %s1592_s26  ;;  %s1689_s8 = sld [smem:[#allocation2 + $0x40]]  ;;  %s1691_s9 = sld [smem:[#allocation2 + $0x41]] }
  0x40   :  { %v282_v8 = vadd.f32 %v1382_v9, %v279_v22  ;;  %v296_v16 = vadd.f32 %v1406_v17, %v293_v23  ;;  %v335_v39 = vadd.f32 %v334_v38, %v1475_v40  ;;  %v349_v47 = vadd.f32 %v348_v2, %v1499_v48  ;;  %s1696_s10 = sld [smem:[#allocation2 + $0x42]]  ;;  %s1698_s11 = sld [smem:[#allocation2 + $0x43]] }
  0x41   :  { %v310_v54 = vadd.f32 %v1430_v25, %v307_v1  ;;  %v324_v24 = vadd.f32 %v1454_v33, %v321_v31  ;;  %v362_v55 = vstv %s1602_s27  ;;  %v376_v32 = vstv %s1604_s28  ;;  %s1703_s12 = sld [smem:[#allocation2 + $0x44]]  ;;  %s1705_s1 = sld [smem:[#allocation2 + $0x45]] }
  0x42   :  { %v285_v63 = vadd.f32 %v1391_v12, %v282_v8  ;;  %v299_v6 = vadd.f32 %v1415_v20, %v296_v16  ;;  %v338_v7 = vadd.f32 %v1478_v41, %v335_v39  ;;  %v352_v9 = vadd.f32 %v1502_v49, %v349_v47  ;;  %s1710_s13 = sld [smem:[#allocation2 + $0x46]]  ;;  %s1712_s14 = sld [smem:[#allocation2 + $0x48]] }
  0x43   :  { %v313_v17 = vadd.f32 %v1439_v28, %v310_v54  ;;  %v327_v40 = vadd.f32 %v1463_v36, %v324_v24  ;;  %v363_v48 = vadd.f32 %v362_v55, %v1523_v56  ;;  %v377_v25 = vadd.f32 %v376_v32, %v1547_v4  ;;  %s1717_s15 = sld [smem:[#allocation2 + $0x47]]  ;;  %s1719_s17 = sld [smem:[#allocation2 + $0x49]] }
  0x44   :  { %v288_v33 = vadd.f32 %v1394_v13, %v285_v63  ;;  %v302_v22 = vadd.f32 %v1418_v21, %v299_v6  ;;  %v341_v12 = vadd.f32 %v1487_v44, %v338_v7  ;;  %v355_v20 = vadd.f32 %v1511_v52, %v352_v9  ;;  %s1728_s18 = sld [smem:[#allocation2 + $0x4a]]  ;;  %s1730_s19 = sld [smem:[#allocation2 + $0x4b]] }
  0x45   :  { %v316_v28 = vadd.f32 %v1442_v29, %v313_v17  ;;  %v330_v36 = vadd.f32 %v1466_v37, %v327_v40  ;;  %v366_v41 = vadd.f32 %v1526_v57, %v363_v48  ;;  %v380_v49 = vadd.f32 %v1550_v5, %v377_v25  ;;  %s1735_s21 = sld [smem:[#allocation2 + $0x4c]]  ;;  %s1738_s16 = sld [smem:[#allocation2 + $0x4d]] }
  0x46   :  { %1190 = vtanh.f32 %v288_v33  ;;  %v344_v13 = vadd.f32 %v1490_v45, %v341_v12  ;;  %v358_v21 = vadd.f32 %v1514_v53, %v355_v20  ;;  %v390_v44 = vstv %s1638_s0  ;;  %s1740_s20 = sld [smem:[#allocation2 + $0x4e]]  ;;  %s1745_s22 = sld [smem:[#allocation2 + $0x4f]] }
  0x47   :  { %1192 = vtanh.f32 %v302_v22  ;;  %v369_v29 = vadd.f32 %v1535_v60, %v366_v41  ;;  %v383_v37 = vadd.f32 %v1559_v10, %v380_v49  ;;  %v391_v52 = vadd.f32 %v390_v44, %v1571_v18  ;;  %s1747_s23 = sld [smem:[#allocation2 + $0x50]]  ;;  %s1754_s24 = sld [smem:[#allocation2 + $0x51]] }
  0x48   :  { %1194 = vtanh.f32 %v316_v28  ;;  %v404_v45 = vstv %s1644_s29  ;;  %v418_v56 = vstv %s1650_s30  ;;  %v432_v53 = vstv %s1652_s3  ;;  %s1756_s25 = sld [smem:[#allocation2 + $0x52]]  ;;  %s1762_s26 = sld [smem:[#allocation2 + $0x54]] }
  0x49   :  { %1196 = vtanh.f32 %v330_v36  ;;  %v372_v57 = vadd.f32 %v1538_v61, %v369_v29  ;;  %v386_v60 = vadd.f32 %v1562_v11, %v383_v37  ;;  %v394_v4 = vadd.f32 %v1574_v19, %v391_v52  ;;  %s1764_s27 = sld [smem:[#allocation2 + $0x55]]  ;;  %s1772_s28 = sld [smem:[#allocation2 + $0x56]] }
  0x4a   :  { %1198 = vtanh.f32 %v344_v13  ;;  %v405_v5 = vadd.f32 %v404_v45, %v1595_v34  ;;  %v419_v10 = vadd.f32 %v418_v56, %v1613_v46  ;;  %v433_v18 = vadd.f32 %v432_v53, %v1626_v59  ;;  %s1774_s0 = sld [smem:[#allocation2 + $0x57]]  ;;  %s1783_s29 = sld [smem:[#allocation2 + $0x58]] }
  0x4b   :  { %1200 = vtanh.f32 %v358_v21  ;;  %v397_v61 = vadd.f32 %v1583_v26, %v394_v4  ;;  %v427_v11 = vmul.f32 %v426_v51, %v1368_v3  ;;  %v441_v19 = vmul.f32 %v440_v15, %v1368_v3  ;;  %s1785_s30 = sld [smem:[#allocation2 + $0x59]]  ;;  %s1792_s3 = sld [smem:[#allocation2 + $0x53]] }
  0x4c   :  { %1202 = vtanh.f32 %v372_v57  ;;  %v408_v34 = vadd.f32 %v1598_v35, %v405_v5  ;;  %v422_v46 = vadd.f32 %v1617_v50, %v419_v10  ;;  %v436_v26 = vadd.f32 %v1629_v62, %v433_v18 }
  0x4d   :  { %1204 = vtanh.f32 %v386_v60  ;;  %v400_v51 = vadd.f32 %v1586_v27, %v397_v61  ;;  %v444_v27 = vstv %s1674_s4  ;;  %v448_v50 = vstv %s1676_s5  ;;  %s1799_s4 = sld [smem:[#allocation2 + $0x5a]]  ;;  %s1801_s5 = sld [smem:[#allocation2 + $0x5b]] }
  0x4e   :  { %v411_v3 = vadd.f32 %v1607_v42, %v408_v34  ;;  %v425_v59 = vadd.f32 %v1623_v58, %v422_v46  ;;  %v439_v35 = vadd.f32 %v1635_v14, %v436_v26  ;;  %v451_v62 = vstv %s1682_s6  ;;  %s1825_s6 = sld [smem:[#allocation2 + $0x5c]] }
  0x4f   :  { %1206 = vtanh.f32 %v400_v51  ;;  %v454_v23 = vstv %s1684_s7  ;;  %v457_v30 = vstv %s1689_s8  ;;  %v460_v1 = vstv %s1691_s9  ;;  %s1827_s7 = sld [smem:[#allocation2 + $0x5d]]  ;;  %s1839_s8 = sld [smem:[#allocation2 + $0x5e]] }
  0x50   :  { %v1752_v15 = vpop.eup %1190  ;;  %v414_v42 = vadd.f32 %v1610_v43, %v411_v3  ;;  %v428_v58 = vadd.f32 %v427_v11, %v425_v59  ;;  %v442_v14 = vadd.f32 %v441_v19, %v439_v35  ;;  %v463_v31 = vstv %s1696_s10  ;;  %s1841_s9 = sld [smem:[#allocation2 + $0x5f]]  ;;  %s1857_s10 = sld [smem:[#allocation2 + $0x60]] }
  0x51   :  { %v1760_v0 = vpop.eup %1192  ;;  %v466_v38 = vstv %s1698_s11  ;;  %v1777_v43 = vmul.f32 %v1752_v15, %v444_v27  ;;  %v469_v8 = vstv %s1703_s12  ;;  %v482_v16 = vstv %s1712_s14  ;;  %s1859_s11 = sld [smem:[#allocation2 + $0x61]]  ;;  %s1869_s12 = sld [smem:[#allocation2 + $0x62]] }
  0x52   :  { %2798 = vst [vmem:[#allocation11_spill] sm:$0xff] %v1760_v0  ;;  %v1770_v2 = vpop.eup %1194  ;;  %1208 = vtanh.f32 %v414_v42  ;;  %v472_v47 = vstv %s1705_s1  ;;  %v475_v54 = vstv %s1710_s13  ;;  %v486_v24 = vstv %s1719_s17  ;;  %s1871_s14 = sld [smem:[#allocation2 + $0x63]]  ;;  %s1879_s17 = sld [smem:[#allocation2 + $0x64]] }
  0x53   :  { %v1781_v39 = vpop.eup %1196  ;;  %1210 = vtanh.f32 %v428_v58  ;;  %v478_v32 = vstv %s1717_s15  ;;  %v489_v63 = vstv %s1728_s18  ;;  %v492_v6 = vstv %s1730_s19  ;;  %s1881_s18 = sld [smem:[#allocation2 + $0x65]]  ;;  %s1889_s19 = sld [smem:[#allocation2 + $0x66]] }
  0x54   :  { %v1790_v55 = vpop.eup %1198  ;;  %1212 = vtanh.f32 %v442_v14  ;;  %v1804_v9 = vmul.f32 %v1760_v0, %v448_v50  ;;  %v1807_v17 = vmul.f32 %v1770_v2, %v451_v62  ;;  %v1810_v40 = vmul.f32 %v1752_v15, %v482_v16  ;;  %s1953_s1 = sld [smem:[#allocation2 + $0x6e]]  ;;  %s1965_s13 = sld [smem:[#allocation2 + $0x70]] }
  0x55   :  { %2799 = vst [vmem:[#allocation12_spill] sm:$0xff] %v1790_v55  ;;  %v1797_v7 = vpop.eup %1200  ;;  %v495_v48 = vstv %s1735_s21  ;;  %v1816_v33 = vmul.f32 %v1781_v39, %v454_v23  ;;  %v1819_v22 = vmul.f32 %v1760_v0, %v486_v24  ;;  %v498_v12 = vstv %s1738_s16  ;;  %s1891_s21 = sld [smem:[#allocation2 + $0x67]]  ;;  %s1905_s16 = sld [smem:[#allocation2 + $0x68]] }
  0x56   :  { %v1813_v25 = vpop.eup %1202  ;;  %v501_v20 = vstv %s1740_s20  ;;  %v1830_v36 = vmul.f32 %v1790_v55, %v457_v30  ;;  %v1833_v41 = vmul.f32 %v1770_v2, %v489_v63  ;;  %v1836_v49 = vmul.f32 %v1781_v39, %v492_v6  ;;  %s1907_s20 = sld [smem:[#allocation2 + $0x69]]  ;;  %s1989_s15 = sld [smem:[#allocation2 + $0x74]] }
  0x57   :  { %v1823_v28 = vpop.eup %1204  ;;  %v504_v13 = vstv %s1745_s22  ;;  %v1844_v21 = vmul.f32 %v1797_v7, %v460_v1  ;;  %v1847_v44 = vmul.f32 %v1813_v25, %v463_v31  ;;  %v1850_v29 = vmul.f32 %v1790_v55, %v495_v48  ;;  %s1919_s22 = sld [smem:[#allocation2 + $0x6a]] }
  0x58   :  { %v1853_v37 = vmul.f32 %v1797_v7, %v498_v12  ;;  %v1862_v45 = vmul.f32 %v1823_v28, %v466_v38  ;;  %v1865_v56 = vmul.f32 %v1813_v25, %v501_v20  ;;  %v507_v53 = vstv %s1747_s23  ;;  %s1921_s23 = sld [smem:[#allocation2 + $0x6b]] }
  0x59   :  { %2800 = vst [vmem:[#allocation13_spill] sm:$0xff] %v1847_v44  ;;  %v1855_v52 = vpop.eup %1206  ;;  %v520_v57 = vstv %s1762_s26  ;;  %v1874_v60 = vmul.f32 %v1823_v28, %v504_v13  ;;  %v510_v4 = vstv %s1754_s24  ;;  %v513_v5 = vstv %s1756_s25  ;;  %s1937_s24 = sld [smem:[#allocation2 + $0x6c]]  ;;  %s1939_s25 = sld [smem:[#allocation2 + $0x6d]] }
  0x5a   :  { %2801 = vst [vmem:[#allocation14_spill] sm:$0xff] %v1862_v45  ;;  %2802 = vst [vmem:[#allocation15_spill] sm:$0xff] %v1865_v56  ;;  %v524_v10 = vstv %s1764_s27  ;;  %v527_v18 = vstv %s1772_s28  ;;  %v530_v61 = vstv %s1774_s0  ;;  %v533_v11 = vstv %s1783_s29  ;;  %s1955_s26 = sld [smem:[#allocation2 + $0x6f]]  ;;  %s1967_s27 = sld [smem:[#allocation2 + $0x71]] }
  0x5b   :  { %2803 = vst [vmem:[#allocation16_spill] sm:$0xff] %v1874_v60  ;;  %v536_v19 = vstv %s1785_s30  ;;  %v1894_v46 = vmul.f32 %v1855_v52, %v469_v8  ;;  %v1897_v26 = vmul.f32 %v1855_v52, %v507_v53  ;;  %v516_v51 = vstv %s1792_s3  ;;  %s1977_s28 = sld [smem:[#allocation2 + $0x72]]  ;;  %s1979_s0 = sld [smem:[#allocation2 + $0x73]] }
  0x5c   :  { %v1887_v34 = vpop.eup %1208  ;;  %v1901_v3 = vmul.f32 %v1752_v15, %v520_v57  ;;  %v1910_v35 = vmul.f32 %v1760_v0, %v524_v10  ;;  %v1913_v27 = vmul.f32 %v1770_v2, %v527_v18  ;;  %v539_v50 = vstv %s1799_s4  ;;  %s1991_s29 = sld [smem:[#allocation2 + $0x75]]  ;;  %s2001_s30 = sld [smem:[#allocation2 + $0x76]] }
  0x5d   :  { %2804 = vst [vmem:[#allocation17_spill] sm:$0xff] %v1894_v46  ;;  %2805 = vst [vmem:[#allocation18_spill] sm:$0xff] %v1897_v26  ;;  %v1903_v59 = vpop.eup %1210  ;;  %v542_v62 = vstv %s1801_s5  ;;  %v1926_v58 = vmul.f32 %v1887_v34, %v472_v47  ;;  %v1929_v14 = vmul.f32 %v1781_v39, %v530_v61  ;;  %v1932_v23 = vmul.f32 %v1790_v55, %v533_v11  ;;  %s2003_s3 = sld [smem:[#allocation2 + $0x77]]  ;;  %s2015_s4 = sld [smem:[#allocation2 + $0x78]] }
  0x5e   :  { %2806 = vst [vmem:[#allocation19_spill] sm:$0xff] %v1903_v59  ;;  %v1917_v42 = vpop.eup %1212  ;;  %v1935_v30 = vmul.f32 %v1797_v7, %v536_v19  ;;  %v1944_v1 = vmul.f32 %v1903_v59, %v475_v54  ;;  %v1947_v31 = vmul.f32 %v1887_v34, %v510_v4  ;;  %v1950_v38 = vmul.f32 %v1903_v59, %v513_v5  ;;  %s2017_s5 = sld [smem:[#allocation2 + $0x79]] }
  0x5f   :  { %2807 = vst [vmem:[#allocation20_spill] sm:$0xff] %v1926_v58  ;;  %v545_v8 = vstv %s1825_s6  ;;  %v1958_v16 = vmul.f32 %v1813_v25, %v539_v50  ;;  %v1961_v47 = vmul.f32 %v1823_v28, %v542_v62  ;;  %v548_v54 = vstv %s1827_s7  ;;  %s2027_s6 = sld [smem:[#allocation2 + $0x7a]]  ;;  %s2029_s7 = sld [smem:[#allocation2 + $0x7b]] }
  0x60   :  { %2808 = vst [vmem:[#allocation21_spill] sm:$0xff] %v1935_v30  ;;  %2809 = vst [vmem:[#allocation22_spill] sm:$0xff] %v1944_v1  ;;  %v551_v24 = vstv %s1839_s8  ;;  %v1972_v63 = vmul.f32 %v1917_v42, %v478_v32  ;;  %v554_v6 = vstv %s1841_s9  ;;  %v558_v48 = vstv %s1857_s10  ;;  %s2039_s8 = sld [smem:[#allocation2 + $0x7c]]  ;;  %s2041_s9 = sld [smem:[#allocation2 + $0x7d]] }
  0x61   :  { %2810 = vst [vmem:[#allocation23_spill] sm:$0xff] %v1947_v31  ;;  %2811 = vst [vmem:[#allocation24_spill] sm:$0xff] %v1950_v38  ;;  %v562_v12 = vstv %s1859_s11  ;;  %v1982_v20 = vmul.f32 %v1917_v42, %v516_v51  ;;  %v1985_v13 = vmul.f32 %v1855_v52, %v545_v8  ;;  %v565_v53 = vstv %s1869_s12  ;;  %s2049_s10 = sld [smem:[#allocation2 + $0x7e]]  ;;  %s2051_s11 = sld [smem:[#allocation2 + $0x7f]] }
  0x62   :  { %2812 = vst [vmem:[#allocation25_spill] sm:$0xff] %v1958_v16  ;;  %2813 = vst [vmem:[#allocation26_spill] sm:$0xff] %v1961_v47  ;;  %v568_v57 = vstv %s1871_s14  ;;  %v1994_v32 = vmul.f32 %v1887_v34, %v548_v54  ;;  %v1997_v4 = vmul.f32 %v1903_v59, %v551_v24  ;;  %v571_v5 = vstv %s1879_s17  ;;  %s2061_s12 = sld [smem:[#allocation2 + $0x80]]  ;;  %s2063_s14 = sld [smem:[#allocation2 + $0x81]] }
  0x63   :  { %2814 = vst [vmem:[#allocation27_spill] sm:$0xff] %v1972_v63  ;;  %2815 = vst [vmem:[#allocation28_spill] sm:$0xff] %v1982_v20  ;;  %v574_v10 = vstv %s1881_s18  ;;  %v2006_v18 = vmul.f32 %v1917_v42, %v554_v6  ;;  %v2009_v61 = vmul.f32 %v1752_v15, %v558_v48  ;;  %v2012_v11 = vmul.f32 %v1760_v0, %v562_v12  ;;  %s2073_s17 = sld [smem:[#allocation2 + $0x82]]  ;;  %s2075_s18 = sld [smem:[#allocation2 + $0x83]] }
  0x64   :  { %2816 = vst [vmem:[#allocation29_spill] sm:$0xff] %v1985_v13  ;;  %2817 = vst [vmem:[#allocation30_spill] sm:$0xff] %v1994_v32  ;;  %v577_v19 = vstv %s1889_s19  ;;  %v2020_v51 = vmul.f32 %v1770_v2, %v565_v53  ;;  %v2023_v50 = vmul.f32 %v1781_v39, %v568_v57  ;;  %v580_v62 = vstv %s1891_s21  ;;  %s2087_s19 = sld [smem:[#allocation2 + $0x84]]  ;;  %s2089_s21 = sld [smem:[#allocation2 + $0x85]] }
  0x65   :  { %2818 = vst [vmem:[#allocation31_spill] sm:$0xff] %v1997_v4  ;;  %2819 = vst [vmem:[#allocation32_spill] sm:$0xff] %v2006_v18  ;;  %v583_v8 = vstv %s1905_s16  ;;  %v2032_v54 = vmul.f32 %v1790_v55, %v571_v5  ;;  %v2035_v24 = vmul.f32 %v1797_v7, %v574_v10  ;;  %v586_v6 = vstv %s1907_s20  ;;  %s2099_s16 = sld [smem:[#allocation2 + $0x86]]  ;;  %s2101_s20 = sld [smem:[#allocation2 + $0x87]] }
  0x66   :  { %v589_v48 = vstv %s1919_s22  ;;  %v2044_v12 = vmul.f32 %v1813_v25, %v577_v19  ;;  %v592_v53 = vstv %s1921_s23  ;;  %v596_v57 = vstv %s1937_s24  ;;  %s2111_s22 = sld [smem:[#allocation2 + $0x88]]  ;;  %s2113_s23 = sld [smem:[#allocation2 + $0x89]] }
  0x67   :  { %2820 = vst [vmem:[#allocation33_spill] sm:$0xff] %v2035_v24  ;;  %v600_v18 = vstv %s1939_s25  ;;  %v2054_v5 = vmul.f32 %v1823_v28, %v580_v62  ;;  %v2057_v10 = vmul.f32 %v1855_v52, %v583_v8  ;;  %v603_v20 = vstv %s1953_s1  ;;  %s2121_s24 = sld [smem:[#allocation2 + $0x8a]]  ;;  %s2123_s25 = sld [smem:[#allocation2 + $0x8b]] }
  0x68   :  { %2821 = vst [vmem:[#allocation34_spill] sm:$0xff] %v2044_v12  ;;  %v606_v63 = vstv %s1955_s26  ;;  %v2066_v19 = vmul.f32 %v1887_v34, %v586_v6  ;;  %v2069_v4 = vmul.f32 %v1903_v59, %v589_v48  ;;  %v609_v38 = vstv %s1965_s13  ;;  %s2133_s1 = sld [smem:[#allocation2 + $0x8c]]  ;;  %s2135_s26 = sld [smem:[#allocation2 + $0x8d]] }
  0x69   :  { %2822 = vst [vmem:[#allocation35_spill] sm:$0xff] %v2054_v5  ;;  %2823 = vst [vmem:[#allocation36_spill] sm:$0xff] %v2057_v10  ;;  %v612_v62 = vstv %s1967_s27  ;;  %v2078_v8 = vmul.f32 %v1917_v42, %v592_v53  ;;  %v2081_v1 = vmul.f32 %v1752_v15, %v596_v57  ;;  %v2084_v6 = vmul.f32 %v1760_v0, %v600_v18  ;;  %s2145_s13 = sld [smem:[#allocation2 + $0x8e]]  ;;  %s2147_s27 = sld [smem:[#allocation2 + $0x8f]] }
  0x6a   :  { %2824 = vst [vmem:[#allocation37_spill] sm:$0xff] %v2066_v19  ;;  %2825 = vst [vmem:[#allocation38_spill] sm:$0xff] %v2069_v4  ;;  %v615_v19 = vstv %s1977_s28  ;;  %v2092_v48 = vmul.f32 %v1770_v2, %v603_v20  ;;  %v2095_v53 = vmul.f32 %v1781_v39, %v606_v63  ;;  %v621_v57 = vstv %s1989_s15  ;;  %s2159_s28 = sld [smem:[#allocation2 + $0x90]]  ;;  %s2171_s15 = sld [smem:[#allocation2 + $0x92]] }
  0x6b   :  { %2826 = vst [vmem:[#allocation39_spill] sm:$0xff] %v2078_v8  ;;  %v618_v8 = vstv %s1979_s0  ;;  %v2104_v18 = vmul.f32 %v1790_v55, %v609_v38  ;;  %v2107_v4 = vmul.f32 %v1797_v7, %v612_v62  ;;  %v624_v32 = vstv %s1991_s29  ;;  %s2161_s0 = sld [smem:[#allocation2 + $0x91]]  ;;  %s2173_s29 = sld [smem:[#allocation2 + $0x93]] }
  0x6c   :  { %v627_v20 = vstv %s2001_s30  ;;  %v2116_v63 = vmul.f32 %v1813_v25, %v615_v19  ;;  %v630_v31 = vstv %s2003_s3  ;;  %v634_v58 = vstv %s2015_s4  ;;  %s2183_s30 = sld [smem:[#allocation2 + $0x94]]  ;;  %s2185_s3 = sld [smem:[#allocation2 + $0x95]] }
  0x6d   :  { %2827 = vst [vmem:[#allocation40_spill] sm:$0xff] %v2107_v4  ;;  %v638_v10 = vstv %s2017_s5  ;;  %v2126_v38 = vmul.f32 %v1823_v28, %v618_v8  ;;  %v2129_v62 = vmul.f32 %v1855_v52, %v621_v57  ;;  %v641_v13 = vstv %s2027_s6  ;;  %s2193_s4 = sld [smem:[#allocation2 + $0x96]]  ;;  %s2195_s5 = sld [smem:[#allocation2 + $0x97]] }
  0x6e   :  { %2828 = vst [vmem:[#allocation41_spill] sm:$0xff] %v2116_v63  ;;  %v644_v26 = vstv %s2029_s7  ;;  %v2138_v19 = vmul.f32 %v1887_v34, %v624_v32  ;;  %v2141_v46 = vmul.f32 %v1903_v59, %v627_v20  ;;  %v647_v5 = vstv %s2039_s8  ;;  %s2205_s6 = sld [smem:[#allocation2 + $0x98]]  ;;  %s2207_s7 = sld [smem:[#allocation2 + $0x99]] }
  0x6f   :  { %2829 = vst [vmem:[#allocation42_spill] sm:$0xff] %v2126_v38  ;;  %2830 = vst [vmem:[#allocation43_spill] sm:$0xff] %v2129_v62  ;;  %v650_v8 = vstv %s2041_s9  ;;  %v2150_v57 = vmul.f32 %v1917_v42, %v630_v31  ;;  %v2153_v62 = vmul.f32 %v1752_v15, %v634_v58  ;;  %v2156_v32 = vmul.f32 %v1760_v0, %v638_v10  ;;  %s2217_s8 = sld [smem:[#allocation2 + $0x9a]]  ;;  %s2219_s9 = sld [smem:[#allocation2 + $0x9b]] }
  0x70   :  { %2831 = vst [vmem:[#allocation44_spill] sm:$0xff] %v2138_v19  ;;  %2832 = vst [vmem:[#allocation45_spill] sm:$0xff] %v2141_v46  ;;  %v653_v19 = vstv %s2049_s10  ;;  %v2164_v20 = vmul.f32 %v1770_v2, %v641_v13  ;;  %v2167_v31 = vmul.f32 %v1781_v39, %v644_v26  ;;  %v659_v58 = vstv %s2061_s12  ;;  %s2231_s10 = sld [smem:[#allocation2 + $0x9c]]  ;;  %s2243_s12 = sld [smem:[#allocation2 + $0x9e]] }
  0x71   :  { %2833 = vst [vmem:[#allocation46_spill] sm:$0xff] %v2150_v57  ;;  %v656_v57 = vstv %s2051_s11  ;;  %v2176_v10 = vmul.f32 %v1790_v55, %v647_v5  ;;  %v2179_v46 = vmul.f32 %v1797_v7, %v650_v8  ;;  %v662_v38 = vstv %s2063_s14  ;;  %s2233_s11 = sld [smem:[#allocation2 + $0x9d]]  ;;  %s2245_s14 = sld [smem:[#allocation2 + $0x9f]] }
  0x72   :  { %v665_v13 = vstv %s2073_s17  ;;  %v2188_v26 = vmul.f32 %v1813_v25, %v653_v19  ;;  %v668_v47 = vstv %s2075_s18  ;;  %v672_v63 = vstv %s2087_s19  ;;  %s2255_s17 = sld [smem:[#allocation2 + $0xa0]]  ;;  %s2257_s18 = sld [smem:[#allocation2 + $0xa1]] }
  0x73   :  { %2834 = vst [vmem:[#allocation47_spill] sm:$0xff] %v2176_v10  ;;  %2835 = vst [vmem:[#allocation48_spill] sm:$0xff] %v2179_v46  ;;  %v676_v60 = vstv %s2089_s21  ;;  %v2198_v5 = vmul.f32 %v1823_v28, %v656_v57  ;;  %v2201_v8 = vmul.f32 %v1855_v52, %v659_v58  ;;  %v679_v45 = vstv %s2099_s16  ;;  %s2265_s19 = sld [smem:[#allocation2 + $0xa2]]  ;;  %s2267_s21 = sld [smem:[#allocation2 + $0xa3]] }
  0x74   :  { %2836 = vst [vmem:[#allocation49_spill] sm:$0xff] %v2188_v26  ;;  %v682_v12 = vstv %s2101_s20  ;;  %v2210_v19 = vmul.f32 %v1887_v34, %v662_v38  ;;  %v2213_v26 = vmul.f32 %v1903_v59, %v665_v13  ;;  %v685_v16 = vstv %s2111_s22  ;;  %s2277_s16 = sld [smem:[#allocation2 + $0xa4]]  ;;  %s2279_s20 = sld [smem:[#allocation2 + $0xa5]] }
  0x75   :  { %2837 = vst [vmem:[#allocation50_spill] sm:$0xff] %v2198_v5  ;;  %2838 = vst [vmem:[#allocation51_spill] sm:$0xff] %v2201_v8  ;;  %v688_v57 = vstv %s2113_s23  ;;  %v2222_v58 = vmul.f32 %v1917_v42, %v668_v47  ;;  %v2225_v8 = vmul.f32 %v1752_v15, %v672_v63  ;;  %v2228_v38 = vmul.f32 %v1760_v0, %v676_v60  ;;  %s2289_s22 = sld [smem:[#allocation2 + $0xa6]]  ;;  %s2291_s23 = sld [smem:[#allocation2 + $0xa7]] }
  0x76   :  { %2839 = vst [vmem:[#allocation52_spill] sm:$0xff] %v2210_v19  ;;  %2840 = vst [vmem:[#allocation53_spill] sm:$0xff] %v2213_v26  ;;  %v691_v19 = vstv %s2121_s24  ;;  %v2236_v13 = vmul.f32 %v1770_v2, %v679_v45  ;;  %v2239_v47 = vmul.f32 %v1781_v39, %v682_v12  ;;  %v697_v63 = vstv %s2133_s1  ;;  %s2303_s24 = sld [smem:[#allocation2 + $0xa8]]  ;;  %s2315_s1 = sld [smem:[#allocation2 + $0xaa]] }
  0x77   :  { %2841 = vst [vmem:[#allocation54_spill] sm:$0xff] %v2222_v58  ;;  %v694_v58 = vstv %s2123_s25  ;;  %v2248_v60 = vmul.f32 %v1790_v55, %v685_v16  ;;  %v2251_v26 = vmul.f32 %v1797_v7, %v688_v57  ;;  %v700_v5 = vstv %s2135_s26  ;;  %s2305_s25 = sld [smem:[#allocation2 + $0xa9]]  ;;  %s2317_s26 = sld [smem:[#allocation2 + $0xab]] }
  0x78   :  { %2842 = vst [vmem:[#allocation55_spill] sm:$0xff] %v2239_v47  ;;  %v703_v45 = vstv %s2145_s13  ;;  %v2260_v12 = vmul.f32 %v1813_v25, %v691_v19  ;;  %v706_v46 = vstv %s2147_s27  ;;  %v710_v4 = vstv %s2159_s28  ;;  %s2327_s13 = sld [smem:[#allocation2 + $0xac]]  ;;  %s2329_s27 = sld [smem:[#allocation2 + $0xad]] }
  0x79   :  { %2843 = vst [vmem:[#allocation56_spill] sm:$0xff] %v2248_v60  ;;  %2844 = vst [vmem:[#allocation57_spill] sm:$0xff] %v2251_v26  ;;  %v714_v56 = vstv %s2161_s0  ;;  %v2270_v16 = vmul.f32 %v1823_v28, %v694_v58  ;;  %v2273_v57 = vmul.f32 %v1855_v52, %v697_v63  ;;  %v717_v26 = vstv %s2171_s15  ;;  %s2337_s28 = sld [smem:[#allocation2 + $0xae]]  ;;  %s2347_s0 = sld [smem:[#allocation2 + $0xaf]] }
  0x7a   :  { %2845 = vst [vmem:[#allocation58_spill] sm:$0xff] %v2260_v12  ;;  %v720_v60 = vstv %s2173_s29  ;;  %v2282_v19 = vmul.f32 %v1887_v34, %v700_v5  ;;  %v2285_v12 = vmul.f32 %v1903_v59, %v703_v45  ;;  %v723_v44 = vstv %s2183_s30  ;;  %s2357_s15 = sld [smem:[#allocation2 + $0xb0]]  ;;  %s2359_s29 = sld [smem:[#allocation2 + $0xb1]] }
  0x7b   :  { %2846 = vst [vmem:[#allocation59_spill] sm:$0xff] %v2270_v16  ;;  %2847 = vst [vmem:[#allocation60_spill] sm:$0xff] %v2273_v57  ;;  %v726_v58 = vstv %s2185_s3  ;;  %v2294_v63 = vmul.f32 %v1917_v42, %v706_v46  ;;  %v2297_v57 = vmul.f32 %v1752_v15, %v710_v4  ;;  %v2300_v5 = vmul.f32 %v1760_v0, %v714_v56  ;;  %s2371_s30 = sld [smem:[#allocation2 + $0xb2]]  ;;  %s2373_s3 = sld [smem:[#allocation2 + $0xb3]] }
  0x7c   :  { %2848 = vst [vmem:[#allocation61_spill] sm:$0xff] %v2282_v19  ;;  %2849 = vst [vmem:[#allocation62_spill] sm:$0xff] %v2285_v12  ;;  %v729_v19 = vstv %s2193_s4  ;;  %v2308_v45 = vmul.f32 %v1770_v2, %v717_v26  ;;  %v2311_v46 = vmul.f32 %v1781_v39, %v720_v60  ;;  %v735_v4 = vstv %s2205_s6  ;;  %s2391_s4 = sld [smem:[#allocation2 + $0xcc]]  ;;  %s2401_s6 = sld [smem:[#allocation2 + $0xce]] }
  0x7d   :  { %2850 = vst [vmem:[#allocation63_spill] sm:$0xff] %v2294_v63  ;;  %v732_v63 = vstv %s2195_s5  ;;  %v2320_v56 = vmul.f32 %v1790_v55, %v723_v44  ;;  %v2323_v12 = vmul.f32 %v1797_v7, %v726_v58  ;;  %v738_v16 = vstv %s2207_s7  ;;  %s2393_s5 = sld [smem:[#allocation2 + $0xcd]]  ;;  %s2403_s7 = sld [smem:[#allocation2 + $0xcf]] }
  0x7e   :  { %2851 = vst [vmem:[#allocation64_spill] sm:$0xff] %v2311_v46  ;;  %v741_v26 = vstv %s2217_s8  ;;  %v2332_v60 = vmul.f32 %v1813_v25, %v729_v19  ;;  %v744_v46 = vstv %s2219_s9  ;;  %v748_v47 = vstv %s2231_s10  ;;  %s2413_s8 = sld [smem:[#allocation2 + $0xd0]]  ;;  %s2415_s9 = sld [smem:[#allocation2 + $0xd1]] }
  0x7f   :  { %2852 = vst [vmem:[#allocation65_spill] sm:$0xff] %v2320_v56  ;;  %2853 = vst [vmem:[#allocation66_spill] sm:$0xff] %v2323_v12  ;;  %v752_v24 = vstv %s2233_s11  ;;  %v2340_v44 = vmul.f32 %v1823_v28, %v732_v63  ;;  %v2343_v58 = vmul.f32 %v1855_v52, %v735_v4  ;;  %v755_v12 = vstv %s2243_s12  ;;  %s2425_s10 = sld [smem:[#allocation2 + $0xd2]]  ;;  %s2427_s11 = sld [smem:[#allocation2 + $0xd3]] }
  0x80   :  { %2854 = vst [vmem:[#allocation67_spill] sm:$0xff] %v2332_v60  ;;  %v758_v56 = vstv %s2245_s14  ;;  %v2350_v19 = vmul.f32 %v1887_v34, %v738_v16  ;;  %v2353_v60 = vmul.f32 %v1903_v59, %v741_v26  ;;  %v761_v30 = vstv %s2255_s17  ;;  %s2525_s12 = sld [smem:[#allocation2 + $0xd4]]  ;;  %s2537_s17 = sld [smem:[#allocation2 + $0xd5]] }
  0x81   :  { %v764_v10 = vstv %s2257_s18  ;;  %v2362_v63 = vmul.f32 %v1917_v42, %v744_v46  ;;  %v2365_v4 = vmul.f32 %v1752_v15, %v748_v47  ;;  %v2368_v16 = vmul.f32 %v1760_v0, %v752_v24  ;;  %s2535_s14 = sld [smem:[#allocation2 + $0xb4]]  ;;  %s2543_s18 = sld [smem:[#allocation2 + $0xd6]] }
  0x82   :  { %2855 = vst [vmem:[#allocation68_spill] sm:$0xff] %v2350_v19  ;;  %2856 = vst [vmem:[#allocation69_spill] sm:$0xff] %v2353_v60  ;;  %v767_v26 = vstv %s2265_s19  ;;  %v2376_v60 = vmul.f32 %v1770_v2, %v755_v12  ;;  %v2379_v46 = vmul.f32 %v1781_v39, %v758_v56  ;;  %v773_v47 = vstv %s2277_s16  ;;  %s2549_s19 = sld [smem:[#allocation2 + $0xb5]]  ;;  %s2569_s16 = sld [smem:[#allocation2 + $0xb7]] }
  0x83   :  { %2857 = vst [vmem:[#allocation70_spill] sm:$0xff] %v2362_v63  ;;  %2858 = vst [vmem:[#allocation71_spill] sm:$0xff] %v2365_v4  ;;  %v770_v63 = vstv %s2267_s21  ;;  %v2384_v24 = vmul.f32 %v1790_v55, %v761_v30  ;;  %v776_v4 = vstv %s2279_s20  ;;  %v779_v19 = vstv %s2289_s22  ;;  %s2555_s21 = sld [smem:[#allocation2 + $0xb6]]  ;;  %s2571_s20 = sld [smem:[#allocation2 + $0xb8]] }
  0x84   :  { %2859 = vst [vmem:[#allocation72_spill] sm:$0xff] %v2368_v16  ;;  %2860 = vst [vmem:[#allocation73_spill] sm:$0xff] %v2376_v60  ;;  %v2387_v16 = vmul.f32 %v1797_v7, %v764_v10  ;;  %v2396_v12 = vmul.f32 %v1813_v25, %v767_v26  ;;  %v782_v56 = vstv %s2291_s23  ;;  %v790_v60 = vstv %s2305_s25  ;;  %s2597_s22 = sld [smem:[#allocation2 + $0xb9]]  ;;  %s2599_s23 = sld [smem:[#allocation2 + $0xba]] }
  0x85   :  { %2861 = vst [vmem:[#allocation74_spill] sm:$0xff] %v2379_v46  ;;  %2862 = vst [vmem:[#allocation75_spill] sm:$0xff] %v2384_v24  ;;  %v786_v46 = vstv %s2303_s24  ;;  %v2406_v30 = vmul.f32 %v1823_v28, %v770_v63  ;;  %v2409_v10 = vmul.f32 %v1855_v52, %v773_v47  ;;  %v796_v24 = vstv %s2317_s26  ;;  %s2604_s24 = sld [smem:[#allocation2 + $0xbb]]  ;;  %s2610_s25 = sld [smem:[#allocation2 + $0xbc]] }
  0x86   :  { %2863 = vst [vmem:[#allocation76_spill] sm:$0xff] %v2387_v16  ;;  %2864 = vst [vmem:[#allocation77_spill] sm:$0xff] %v2396_v12  ;;  %v793_v16 = vstv %s2315_s1  ;;  %v2418_v26 = vmul.f32 %v1887_v34, %v776_v4  ;;  %v2421_v12 = vmul.f32 %v1903_v59, %v779_v19  ;;  %v799_v63 = vstv %s2327_s13  ;;  %s2619_s1 = sld [smem:[#allocation2 + $0xbd]]  ;;  %s2621_s26 = sld [smem:[#allocation2 + $0xc0]] }
  0x87   :  { %2865 = vst [vmem:[#allocation78_spill] sm:$0xff] %v2406_v30  ;;  %2866 = vst [vmem:[#allocation79_spill] sm:$0xff] %v2409_v10  ;;  %v802_v30 = vstv %s2329_s27  ;;  %v2430_v47 = vmul.f32 %v1917_v42, %v782_v56  ;;  %v2433_v4 = vmul.f32 %v1752_v15, %v786_v46  ;;  %v2436_v19 = vmul.f32 %v1760_v0, %v790_v60  ;;  %s2626_s13 = sld [smem:[#allocation2 + $0xbe]]  ;;  %s2630_s27 = sld [smem:[#allocation2 + $0xc1]] }
  0x88   :  { %2867 = vst [vmem:[#allocation80_spill] sm:$0xff] %v2418_v26  ;;  %2868 = vst [vmem:[#allocation81_spill] sm:$0xff] %v2421_v12  ;;  %v805_v12 = vstv %s2337_s28  ;;  %v2440_v26 = vmul.f32 %v1770_v2, %v793_v16  ;;  %v2443_v10 = vmul.f32 %v1781_v39, %v796_v24  ;;  %v2446_v59 = vmul.f32 %v1790_v55, %v799_v63  ;;  %s2632_s28 = sld [smem:[#allocation2 + $0xd7]] }
  0x89   :  { %2869 = vst [vmem:[#allocation82_spill] sm:$0xff] %v2430_v47  ;;  %2870 = vst [vmem:[#allocation83_spill] sm:$0xff] %v2436_v19  ;;  %v2449_v56 = vmul.f32 %v1797_v7, %v802_v30  ;;  %v2452_v60 = vmul.f32 %v1813_v25, %v805_v12  ;;  %v446_v0 = vstv %s2391_s4  ;;  %v484_v16 = vstv %s2393_s5  ;;  %s2668_s4 = sld [smem:[#allocation2 + $0xc6]]  ;;  %s2674_s5 = sld [smem:[#allocation2 + $0xc7]] }
  0x8a   :  { %2871 = vst [vmem:[#allocation84_spill] sm:$0xff] %v2440_v26  ;;  %2872 = vst [vmem:[#allocation85_spill] sm:$0xff] %v2446_v59  ;;  %v447_v63 = vadd.f32 %v446_v0, %v1777_v43  ;;  %v485_v59 = vadd.f32 %v484_v16, %v1810_v40  ;;  %v522_v55 = vstv %s2401_s6  ;;  %v560_v30 = vstv %s2403_s7  ;;  %s2676_s6 = sld [smem:[#allocation2 + $0xc8]]  ;;  %s2692_s7 = sld [smem:[#allocation2 + $0xc9]] }
  0x8b   :  { %2873 = vst [vmem:[#allocation86_spill] sm:$0xff] %v2449_v56  ;;  %2874 = vst [vmem:[#allocation87_spill] sm:$0xff] %v2452_v60  ;;  %v523_v56 = vadd.f32 %v522_v55, %v1901_v3  ;;  %v561_v12 = vadd.f32 %v560_v30, %v2009_v61  ;;  %v598_v60 = vstv %s2413_s8  ;;  %v636_v46 = vstv %s2415_s9  ;;  %v2883_v30 = vld [vmem:[#allocation48_spill] sm:$0xff]  ;;  %s2699_s8 = sld [smem:[#allocation2 + $0xca]]  ;;  %s2701_s9 = sld [smem:[#allocation2 + $0xd8]] }
  0x8c   :  { %v450_v19 = vadd.f32 %v1804_v9, %v447_v63  ;;  %v488_v47 = vadd.f32 %v1819_v22, %v485_v59  ;;  %v599_v26 = vadd.f32 %v598_v60, %v2081_v1  ;;  %v637_v24 = vadd.f32 %v636_v46, %v2153_v62  ;;  %v2879_v60 = vld [vmem:[#allocation64_spill] sm:$0xff]  ;;  %v2880_v46 = vld [vmem:[#allocation13_spill] sm:$0xff] }
  0x8d   :  { %v526_v0 = vadd.f32 %v1910_v35, %v523_v56  ;;  %v564_v43 = vadd.f32 %v2012_v11, %v561_v12  ;;  %v674_v40 = vstv %s2425_s10  ;;  %v712_v16 = vstv %s2427_s11  ;;  %v2878_v56 = vld [vmem:[#allocation55_spill] sm:$0xff]  ;;  %v2882_v63 = vld [vmem:[#allocation40_spill] sm:$0xff]  ;;  %v2884_v12 = vld [vmem:[#allocation25_spill] sm:$0xff]  ;;  %s2708_s10 = sld [smem:[#allocation2 + $0xd9]]  ;;  %s2710_s11 = sld [smem:[#allocation2 + $0xe4]] }
  0x8e   :  { %v453_v55 = vadd.f32 %v1807_v17, %v450_v19  ;;  %v491_v3 = vadd.f32 %v1833_v41, %v488_v47  ;;  %v602_v61 = vadd.f32 %v2084_v6, %v599_v26  ;;  %v640_v9 = vadd.f32 %v2156_v32, %v637_v24  ;;  %v2875_v26 = vld [vmem:[#allocation47_spill] sm:$0xff]  ;;  %v2876_v47 = vld [vmem:[#allocation21_spill] sm:$0xff] }
  0x8f   :  { %v529_v22 = vadd.f32 %v1913_v27, %v526_v0  ;;  %v567_v59 = vadd.f32 %v2020_v51, %v564_v43  ;;  %v675_v1 = vadd.f32 %v674_v40, %v2225_v8  ;;  %v713_v35 = vadd.f32 %v712_v16, %v2297_v57  ;;  %v2877_v19 = vld [vmem:[#allocation33_spill] sm:$0xff]  ;;  %v2881_v24 = vld [vmem:[#allocation15_spill] sm:$0xff]  ;;  %v2885_v0 = vld [vmem:[#allocation34_spill] sm:$0xff] }
  0x90   :  { %v456_v11 = vadd.f32 %v1816_v33, %v453_v55  ;;  %v494_v62 = vadd.f32 %v1836_v49, %v491_v3  ;;  %v605_v17 = vadd.f32 %v2092_v48, %v602_v61  ;;  %v643_v41 = vadd.f32 %v2164_v20, %v640_v9  ;;  %v2886_v40 = vld [vmem:[#allocation56_spill] sm:$0xff]  ;;  %v2887_v55 = vld [vmem:[#allocation65_spill] sm:$0xff]  ;;  %v2888_v61 = vld [vmem:[#allocation14_spill] sm:$0xff] }
  0x91   :  { %v532_v6 = vadd.f32 %v1929_v14, %v529_v22  ;;  %v570_v32 = vadd.f32 %v2023_v50, %v567_v59  ;;  %v678_v27 = vadd.f32 %v2228_v38, %v675_v1  ;;  %v716_v51 = vadd.f32 %v2300_v5, %v713_v35  ;;  %v2889_v22 = vld [vmem:[#allocation16_spill] sm:$0xff]  ;;  %v2890_v1 = vld [vmem:[#allocation41_spill] sm:$0xff] }
  0x92   :  { %v459_v8 = vadd.f32 %v1830_v36, %v456_v11  ;;  %v497_v57 = vadd.f32 %v1850_v29, %v494_v62  ;;  %v608_v33 = vadd.f32 %v2095_v53, %v605_v17  ;;  %v646_v49 = vadd.f32 %v2167_v31, %v643_v41  ;;  %v2891_v11 = vld [vmem:[#allocation49_spill] sm:$0xff]  ;;  %v2892_v17 = vld [vmem:[#allocation26_spill] sm:$0xff] }
  0x93   :  { %v535_v48 = vadd.f32 %v1932_v23, %v532_v6  ;;  %v573_v20 = vadd.f32 %v2032_v54, %v570_v32  ;;  %v681_v14 = vadd.f32 %v2236_v13, %v678_v27  ;;  %v719_v50 = vadd.f32 %v2308_v45, %v716_v51  ;;  %v2893_v6 = vld [vmem:[#allocation35_spill] sm:$0xff]  ;;  %v2894_v27 = vld [vmem:[#allocation57_spill] sm:$0xff] }
  0x94   :  { %v462_v38 = vadd.f32 %v1844_v21, %v459_v8  ;;  %v500_v5 = vadd.f32 %v1853_v37, %v497_v57  ;;  %v611_v36 = vadd.f32 %v2104_v18, %v608_v33  ;;  %v649_v29 = vadd.f32 %v2875_v26, %v646_v49  ;;  %v2895_v8 = vld [vmem:[#allocation66_spill] sm:$0xff]  ;;  %v2896_v33 = vld [vmem:[#allocation17_spill] sm:$0xff] }
  0x95   :  { %v538_v53 = vadd.f32 %v2876_v47, %v535_v48  ;;  %v576_v31 = vadd.f32 %v2877_v19, %v573_v20  ;;  %v684_v23 = vadd.f32 %v2878_v56, %v681_v14  ;;  %v722_v54 = vadd.f32 %v2879_v60, %v719_v50  ;;  %v2897_v48 = vld [vmem:[#allocation18_spill] sm:$0xff] }
  0x96   :  { %v465_v13 = vadd.f32 %v2880_v46, %v462_v38  ;;  %v503_v45 = vadd.f32 %v2881_v24, %v500_v5  ;;  %v614_v21 = vadd.f32 %v2882_v63, %v611_v36  ;;  %v652_v37 = vadd.f32 %v2883_v30, %v649_v29  ;;  %v2898_v14 = vld [vmem:[#allocation42_spill] sm:$0xff]  ;;  %v2900_v36 = vld [vmem:[#allocation29_spill] sm:$0xff]  ;;  %v2901_v29 = vld [vmem:[#allocation36_spill] sm:$0xff] }
  0x97   :  { %v541_v18 = vadd.f32 %v2884_v12, %v538_v53  ;;  %v579_v43 = vadd.f32 %v2885_v0, %v576_v31  ;;  %v687_v16 = vadd.f32 %v2886_v40, %v684_v23  ;;  %v725_v3 = vadd.f32 %v2887_v55, %v722_v54  ;;  %v2899_v38 = vld [vmem:[#allocation50_spill] sm:$0xff]  ;;  %v2903_v31 = vld [vmem:[#allocation67_spill] sm:$0xff]  ;;  %v2904_v23 = vld [vmem:[#allocation20_spill] sm:$0xff] }
  0x98   :  { %v468_v9 = vadd.f32 %v2888_v61, %v465_v13  ;;  %v506_v59 = vadd.f32 %v2889_v22, %v503_v45  ;;  %v617_v35 = vadd.f32 %v2890_v1, %v614_v21  ;;  %v655_v62 = vadd.f32 %v2891_v11, %v652_v37  ;;  %v2902_v53 = vld [vmem:[#allocation58_spill] sm:$0xff]  ;;  %v2905_v54 = vld [vmem:[#allocation23_spill] sm:$0xff]  ;;  %v2909_v37 = vld [vmem:[#allocation37_spill] sm:$0xff] }
  0x99   :  { %v544_v41 = vadd.f32 %v2892_v17, %v541_v18  ;;  %v582_v32 = vadd.f32 %v2893_v6, %v579_v43  ;;  %v690_v51 = vadd.f32 %v2894_v27, %v687_v16  ;;  %v728_v57 = vadd.f32 %v2895_v8, %v725_v3  ;;  %v2906_v13 = vld [vmem:[#allocation43_spill] sm:$0xff]  ;;  %v2908_v21 = vld [vmem:[#allocation30_spill] sm:$0xff]  ;;  %v2912_v55 = vld [vmem:[#allocation24_spill] sm:$0xff] }
  0x9a   :  { %v471_v49 = vadd.f32 %v2896_v33, %v468_v9  ;;  %v509_v20 = vadd.f32 %v2897_v48, %v506_v59  ;;  %v620_v50 = vadd.f32 %v2898_v14, %v617_v35  ;;  %v658_v5 = vadd.f32 %v2899_v38, %v655_v62  ;;  %v2907_v45 = vld [vmem:[#allocation51_spill] sm:$0xff]  ;;  %v2911_v40 = vld [vmem:[#allocation22_spill] sm:$0xff]  ;;  %v2913_v61 = vld [vmem:[#allocation44_spill] sm:$0xff] }
  0x9b   :  { %v547_v26 = vadd.f32 %v2900_v36, %v544_v41  ;;  %v585_v47 = vadd.f32 %v2901_v29, %v582_v32  ;;  %v693_v19 = vadd.f32 %v2902_v53, %v690_v51  ;;  %v731_v56 = vadd.f32 %v2903_v31, %v728_v57  ;;  %v2910_v18 = vld [vmem:[#allocation59_spill] sm:$0xff]  ;;  %v2914_v22 = vld [vmem:[#allocation52_spill] sm:$0xff]  ;;  %v2916_v11 = vld [vmem:[#allocation38_spill] sm:$0xff] }
  0x9c   :  { %v474_v60 = vadd.f32 %v2904_v23, %v471_v49  ;;  %v512_v46 = vadd.f32 %v2905_v54, %v509_v20  ;;  %v623_v24 = vadd.f32 %v2906_v13, %v620_v50  ;;  %v661_v63 = vadd.f32 %v2907_v45, %v658_v5  ;;  %v2915_v1 = vld [vmem:[#allocation31_spill] sm:$0xff]  ;;  %v2917_v62 = vld [vmem:[#allocation60_spill] sm:$0xff]  ;;  %v2919_v27 = vld [vmem:[#allocation45_spill] sm:$0xff] }
  0x9d   :  { %v550_v30 = vadd.f32 %v2908_v21, %v547_v26  ;;  %v588_v12 = vadd.f32 %v2909_v37, %v585_v47  ;;  %v696_v0 = vadd.f32 %v2910_v18, %v693_v19  ;;  %v734_v43 = vadd.f32 %v2340_v44, %v731_v56  ;;  %v2918_v6 = vld [vmem:[#allocation27_spill] sm:$0xff]  ;;  %v2920_v8 = vld [vmem:[#allocation53_spill] sm:$0xff]  ;;  %v2922_v48 = vld [vmem:[#allocation28_spill] sm:$0xff] }
  0x9e   :  { %v477_v16 = vadd.f32 %v2911_v40, %v474_v60  ;;  %v515_v3 = vadd.f32 %v2912_v55, %v512_v46  ;;  %v626_v9 = vadd.f32 %v2913_v61, %v623_v24  ;;  %v664_v59 = vadd.f32 %v2914_v22, %v661_v63  ;;  %v2923_v14 = vld [vmem:[#allocation61_spill] sm:$0xff]  ;;  %v2926_v26 = vld [vmem:[#allocation68_spill] sm:$0xff]  ;;  %v2928_v19 = vld [vmem:[#allocation19_spill] sm:$0xff] }
  0x9f   :  { %v553_v35 = vadd.f32 %v2915_v1, %v550_v30  ;;  %v591_v44 = vadd.f32 %v2916_v11, %v588_v12  ;;  %v699_v17 = vadd.f32 %v2917_v62, %v696_v0  ;;  %v737_v41 = vadd.f32 %v2343_v58, %v734_v43  ;;  %v2930_v60 = vld [vmem:[#allocation32_spill] sm:$0xff]  ;;  %v2931_v46 = vld [vmem:[#allocation39_spill] sm:$0xff]  ;;  %v2933_v63 = vld [vmem:[#allocation46_spill] sm:$0xff] }
  0xa0   :  { %v480_v32 = vadd.f32 %v2918_v6, %v477_v16  ;;  %v629_v51 = vadd.f32 %v2919_v27, %v626_v9  ;;  %v667_v57 = vadd.f32 %v2920_v8, %v664_v59  ;;  %v2921_v33 = vstv %s2347_s0  ;;  %v2932_v24 = vld [vmem:[#allocation71_spill] sm:$0xff]  ;;  %v2934_v30 = vld [vmem:[#allocation54_spill] sm:$0xff]  ;;  %v2936_v40 = vld [vmem:[#allocation72_spill] sm:$0xff]  ;;  %s2638_s0 = sld [smem:[#allocation2 + $0xc2]] }
  0xa1   :  { %v2567_v49 = vmul.f32 %v1823_v28, %v2921_v33  ;;  %v518_v20 = vadd.f32 %v2922_v48, %v515_v3  ;;  %v702_v50 = vadd.f32 %v2923_v14, %v699_v17  ;;  %v2924_v38 = vstv %s2357_s15  ;;  %v2935_v0 = vld [vmem:[#allocation62_spill] sm:$0xff]  ;;  %v2937_v3 = vld [vmem:[#allocation69_spill] sm:$0xff]  ;;  %v2939_v11 = vld [vmem:[#allocation11_spill] sm:$0xff]  ;;  %s2642_s15 = sld [smem:[#allocation2 + $0xc3]] }
  0xa2   :  { %v2578_v58 = vmul.f32 %v1855_v52, %v2924_v38  ;;  %v2925_v5 = vstv %s2359_s29  ;;  %v740_v29 = vadd.f32 %v2926_v26, %v737_v41  ;;  %v750_v47 = vstv %s2525_s12  ;;  %v2938_v1 = vld [vmem:[#allocation73_spill] sm:$0xff]  ;;  %v2940_v17 = vld [vmem:[#allocation83_spill] sm:$0xff]  ;;  %v2943_v48 = vld [vmem:[#allocation84_spill] sm:$0xff]  ;;  %s2647_s29 = sld [smem:[#allocation2 + $0xc4]]  ;;  %s2715_s12 = sld [smem:[#allocation2 + $0xda]] }
  0xa3   :  { %v2583_v36 = vmul.f32 %v1887_v34, %v2925_v5  ;;  %v2927_v53 = vstv %s2371_s30  ;;  %v2929_v56 = vstv %s2373_s3  ;;  %1214 = vtanh.f32 %v480_v32  ;;  %v2941_v32 = vld [vmem:[#allocation63_spill] sm:$0xff]  ;;  %s2654_s30 = sld [smem:[#allocation2 + $0xbf]]  ;;  %s2661_s3 = sld [smem:[#allocation2 + $0xc5]] }
  0xa4   :  { %v2590_v31 = vmul.f32 %v2928_v19, %v2927_v53  ;;  %v2595_v23 = vmul.f32 %v1917_v42, %v2929_v56  ;;  %v556_v54 = vadd.f32 %v2930_v60, %v553_v35  ;;  %v594_v13 = vadd.f32 %v2931_v46, %v591_v44  ;;  %v2944_v38 = vld [vmem:[#allocation75_spill] sm:$0xff]  ;;  %v2945_v56 = vld [vmem:[#allocation12_spill] sm:$0xff] }
  0xa5   :  { %v751_v45 = vadd.f32 %v750_v47, %v2932_v24  ;;  %v632_v21 = vadd.f32 %v2933_v63, %v629_v51  ;;  %v670_v37 = vadd.f32 %v2934_v30, %v667_v57  ;;  %v788_v12 = vstv %s2537_s17  ;;  %v2942_v51 = vld [vmem:[#allocation74_spill] sm:$0xff]  ;;  %s2727_s17 = sld [smem:[#allocation2 + $0xdc]] }
  0xa6   :  { %v824_v18 = vstv %s2535_s14  ;;  %1216 = vtanh.f32 %v518_v20  ;;  %v705_v43 = vadd.f32 %v2935_v0, %v702_v50  ;;  %v826_v55 = vstv %s2543_s18  ;;  %s2722_s14 = sld [smem:[#allocation2 + $0xdb]] }
  0xa7   :  { %v754_v16 = vadd.f32 %v2936_v40, %v751_v45  ;;  %v743_v61 = vadd.f32 %v2937_v3, %v740_v29  ;;  %v789_v9 = vadd.f32 %v788_v12, %v2433_v4  ;;  %v825_v22 = vmul.f32 %v1752_v15, %v824_v18  ;;  %v2947_v45 = vld [vmem:[#allocation76_spill] sm:$0xff]  ;;  %s2735_s18 = sld [smem:[#allocation2 + $0xcb]] }
  0xa8   :  { %v828_v59 = vstv %s2549_s19  ;;  %1218 = vtanh.f32 %v556_v54  ;;  %v831_v62 = vstv %s2555_s21  ;;  %v708_v27 = vadd.f32 %v2941_v32, %v705_v43  ;;  %v2949_v43 = vld [vmem:[#allocation77_spill] sm:$0xff]  ;;  %v2952_v32 = vld [vmem:[#allocation87_spill] sm:$0xff]  ;;  %s2737_s19 = sld [smem:[#allocation2 + $0xdd]]  ;;  %s2745_s21 = sld [smem:[#allocation2 + $0xde]] }
  0xa9   :  { %v757_v35 = vadd.f32 %v2938_v1, %v754_v16  ;;  %v829_v44 = vmul.f32 %v2939_v11, %v828_v59  ;;  %1220 = vtanh.f32 %v594_v13  ;;  %v792_v4 = vadd.f32 %v2940_v17, %v789_v9  ;;  %v2946_v13 = vld [vmem:[#allocation70_spill] sm:$0xff] }
  0xaa   :  { %v827_v41 = vadd.f32 %v826_v55, %v825_v22  ;;  %v832_v6 = vmul.f32 %v1770_v2, %v831_v62  ;;  %v834_v57 = vstv %s2569_s16  ;;  %v837_v33 = vstv %s2571_s20  ;;  %s2753_s16 = sld [smem:[#allocation2 + $0xdf]]  ;;  %s2759_s20 = sld [smem:[#allocation2 + $0xe0]] }
  0xab   :  { %v760_v8 = vadd.f32 %v2942_v51, %v757_v35  ;;  %1222 = vtanh.f32 %v632_v21  ;;  %v795_v20 = vadd.f32 %v2943_v48, %v792_v4  ;;  %v835_v50 = vmul.f32 %v1781_v39, %v834_v57 }
  0xac   :  { %v830_v14 = vadd.f32 %v829_v44, %v827_v41  ;;  %1224 = vtanh.f32 %v670_v37  ;;  %v840_v26 = vstv %s2597_s22  ;;  %v843_v29 = vstv %s2599_s23  ;;  %v2951_v44 = vld [vmem:[#allocation78_spill] sm:$0xff]  ;;  %s2764_s22 = sld [smem:[#allocation2 + $0xe1]]  ;;  %s1182_s23 = sld [smem:[#allocation2 + $0xe2]] }
  0xad   :  { %v763_v5 = vadd.f32 %v2944_v38, %v760_v8  ;;  %v798_v47 = vadd.f32 %v2443_v10, %v795_v20  ;;  %v838_v60 = vmul.f32 %v2945_v56, %v837_v33  ;;  %v846_v54 = vstv %s2604_s24  ;;  %v2652_v46 = vpop.eup %1214  ;;  %v2948_v10 = vld [vmem:[#allocation85_spill] sm:$0xff]  ;;  %v2953_v33 = vld [vmem:[#allocation79_spill] sm:$0xff]  ;;  %s1183_s24 = sld [smem:[#allocation2 + $0xe3]] }
  0xae   :  { %v833_v53 = vadd.f32 %v832_v6, %v830_v14  ;;  %1226 = vtanh.f32 %v708_v27  ;;  %v2657_v24 = vadd.f32 %v2946_v13, %v743_v61  ;;  %v849_v21 = vstv %s2610_s25  ;;  %v2950_v61 = vld [vmem:[#allocation86_spill] sm:$0xff]  ;;  %s1302_s25 = smov [#allocation7]  }
  0xaf   :  { %v766_v63 = vadd.f32 %v2947_v45, %v763_v5  ;;  %v801_v30 = vadd.f32 %v2948_v10, %v798_v47  ;;  %v841_v12 = vmul.f32 %v1797_v7, %v840_v26  ;;  %v844_v18 = vmul.f32 %v1813_v25, %v843_v29  ;;  %v2955_v10 = vld [vmem:[#allocation81_spill] sm:$0xff] }
  0xb0   :  { %v836_v37 = vadd.f32 %v835_v50, %v833_v53  ;;  %v2666_v0 = vpop.eup %1216  ;;  %v847_v16 = vmul.f32 %v1823_v28, %v846_v54  ;;  %v852_v55 = vstv %s2619_s1  ;;  %v862_v3 = vstv %s2621_s26  ;;  %s944_s1 = sshll.u32 %s1302_s25, 4  ;;  %s945_s1 = int_to_ptr.vmem [resolvable:$true] %s944_s1 }
  0xb1   :  { %v769_v40 = vadd.f32 %v2949_v43, %v766_v63  ;;  %v804_v9 = vadd.f32 %v2950_v61, %v801_v30  ;;  %v850_v59 = vmul.f32 %v1855_v52, %v849_v21  ;;  %v855_v1 = vstv %s2626_s13  ;;  %s1270_s26 = scalar_lea.vmem %s945_s1, 128  ;;  %p1275_p12 = scmp.lt.s32.totalorder %s945_s1, %s945_s1 }
  0xb2   :  { %v839_v22 = vadd.f32 %v838_v60, %v836_v37  ;;  %v2681_v35 = vpop.eup %1218  ;;  %v863_v17 = vmul.f32 %v1752_v15, %v862_v3  ;;  %v864_v4 = vstv %s2632_s28  ;;  %v866_v41 = vstv %s2630_s27  ;;  %p1271_p11 = scmp.ne.s32.totalorder %s945_s1, %s1270_s26  ;;  %p1276_p13 = scmp.lt.s32.totalorder %s1270_s26, %s1270_s26 }
  0xb3   :  { %v772_v62 = vadd.f32 %v2951_v44, %v769_v40  ;;  %v2687_v6 = vpop.eup %1220  ;;  %v807_v27 = vadd.f32 %v2952_v32, %v804_v9  ;;  %v867_v8 = vmul.f32 %v2939_v11, %v866_v41  ;;  %v869_v57 = vstv %s2638_s0 }
  0xb4   :  { %v842_v51 = vadd.f32 %v841_v12, %v839_v22  ;;  %v865_v20 = vadd.f32 %v864_v4, %v863_v17  ;;  %v870_v14 = vmul.f32 %v1770_v2, %v869_v57  ;;  %v872_v15 = vstv %s2642_s15  ;;  %v2954_v2 = vld [vmem:[#allocation80_spill] sm:$0xff]  ;;  %p1277_p0 = por %p1276_p13, %p1275_p12 }
  0xb5   :  { %v775_v48 = vadd.f32 %v2953_v33, %v772_v62  ;;  %v2697_v50 = vpop.eup %1222  ;;  %v810_v38 = vadd.f32 %v2567_v49, %v807_v27  ;;  %v853_v5 = vmul.f32 %v1887_v34, %v852_v55  ;;  %v875_v26 = vstv %s2647_s29 }
  0xb6   :  { %v845_v11 = vadd.f32 %v844_v18, %v842_v51  ;;  %v2706_v29 = vpop.eup %1224  ;;  %v858_v53 = vstv %s2654_s30  ;;  %v868_v60 = vadd.f32 %v867_v8, %v865_v20  ;;  %v873_v54 = vmul.f32 %v1781_v39, %v872_v15  ;;  %p1278_p1 = pnand %p1277_p0, %p1271_p11 }
  0xb7   :  { %v778_v47 = vadd.f32 %v2954_v2, %v775_v48  ;;  %v813_v49 = vadd.f32 %v2578_v58, %v810_v38  ;;  %v856_v45 = vmul.f32 %v2928_v19, %v855_v1  ;;  %v878_v63 = vstv %s2661_s3 }
  0xb8   :  { %v848_v13 = vadd.f32 %v847_v16, %v845_v11  ;;  %v2720_v21 = vpop.eup %1226  ;;  %v871_v37 = vadd.f32 %v870_v14, %v868_v60  ;;  %v876_v12 = vmul.f32 %v2945_v56, %v875_v26  ;;  %v881_v18 = vstv %s2668_s4  ;;  %v2956_v56 = vld [vmem:[#allocation82_spill] sm:$0xff] }
  0xb9   :  { %v781_v30 = vadd.f32 %v2955_v10, %v778_v47  ;;  %v816_v39 = vadd.f32 %v2583_v36, %v813_v49  ;;  %v884_v58 = vstv %s2674_s5  ;;  %v887_v40 = vstv %s2676_s6 }
  0xba   :  { %v851_v43 = vadd.f32 %v850_v59, %v848_v13  ;;  %1228 = vtanh.f32 %v2657_v24  ;;  %v859_v16 = vmul.f32 %v1917_v42, %v858_v53  ;;  %v874_v55 = vadd.f32 %v873_v54, %v871_v37 }
  0xbb   :  { %v879_v3 = vmul.f32 %v1797_v7, %v878_v63  ;;  %v784_v36 = vadd.f32 %v2956_v56, %v781_v30  ;;  %v819_v61 = vadd.f32 %v2590_v31, %v816_v39  ;;  %v882_v24 = vmul.f32 %v1813_v25, %v881_v18 }
  0xbc   :  { %v854_v9 = vadd.f32 %v853_v5, %v851_v43  ;;  %v877_v22 = vadd.f32 %v876_v12, %v874_v55  ;;  %v885_v59 = vmul.f32 %v1823_v28, %v884_v58  ;;  %v888_v1 = vmul.f32 %v1855_v52, %v887_v40 }
  0xbd   :  { %v890_v7 = vstv %s2692_s7  ;;  %v822_v44 = vadd.f32 %v2595_v23, %v819_v61  ;;  %v893_v17 = vstv %s2699_s8  ;;  %v900_v4 = vstv %s2701_s9 }
  0xbe   :  { %v857_v62 = vadd.f32 %v856_v45, %v854_v9  ;;  %v880_v31 = vadd.f32 %v879_v3, %v877_v22  ;;  %v901_v41 = vmul.f32 %v2652_v46, %v900_v4  ;;  %v902_v25 = vstv %s2710_s11 }
  0xbf   :  { %v904_v32 = vstv %s2708_s10  ;;  %1230 = vtanh.f32 %v784_v36  ;;  %v907_v27 = vstv %s2715_s12  ;;  %v910_v57 = vstv %s2722_s14 }
  0xc0   :  { %v860_v28 = vadd.f32 %v859_v16, %v857_v62  ;;  %v905_v52 = vmul.f32 %v2666_v0, %v904_v32  ;;  %v883_v23 = vadd.f32 %v882_v24, %v880_v31  ;;  %v903_v51 = vadd.f32 %v902_v25, %v901_v41 }
  0xc1   :  { %v908_v8 = vmul.f32 %v2681_v35, %v907_v27  ;;  %1232 = vtanh.f32 %v822_v44  ;;  %v913_v46 = vstv %s2727_s17  ;;  %v891_v48 = vmul.f32 %v1887_v34, %v890_v7 }
  0xc2   :  { %v886_v33 = vadd.f32 %v885_v59, %v883_v23  ;;  %v906_v20 = vadd.f32 %v905_v52, %v903_v51  ;;  %v911_v14 = vmul.f32 %v2687_v6, %v910_v57  ;;  %v894_v0 = vmul.f32 %v2928_v19, %v893_v17 }
  0xc3   :  { %v896_v15 = vstv %s2735_s18  ;;  %v916_v38 = vstv %s2737_s19  ;;  %1234 = vtanh.f32 %v860_v28  ;;  %v914_v26 = vmul.f32 %v2697_v50, %v913_v46 }
  0xc4   :  { %v1229_v35 = vpop.eup %1228  ;;  %v889_v11 = vadd.f32 %v888_v1, %v886_v33  ;;  %v909_v5 = vadd.f32 %v908_v8, %v906_v20  ;;  %v919_v2 = vstv %s2745_s21  ;;  %v897_v6 = vmul.f32 %v1917_v42, %v896_v15 }
  0xc5   :  { %v917_v53 = vmul.f32 %v2706_v29, %v916_v38  ;;  %v922_v60 = vstv %s2753_s16  ;;  %v920_v49 = vmul.f32 %v2720_v21, %v919_v2  ;;  %v925_v45 = vstv %s2759_s20 }
  0xc6   :  { %v892_v34 = vadd.f32 %v891_v48, %v889_v11  ;;  %v912_v47 = vadd.f32 %v911_v14, %v909_v5  ;;  %v923_v30 = vmul.f32 %v1229_v35, %v922_v60  ;;  %v928_v37 = vstv %s2764_s22 }
  0xc7   :  { %v931_v29 = vstv %s1182_s23  ;;  %v934_v55 = vstv %s1183_s24 }
  0xc8   :  { %v895_v19 = vadd.f32 %v894_v0, %v892_v34  ;;  %v915_v54 = vadd.f32 %v914_v26, %v912_v47 }
  0xc9   :  { %v1231_v13 = vpop.eup %1230 }
  0xca   :  { %v898_v63 = vadd.f32 %v897_v6, %v895_v19  ;;  %v918_v10 = vadd.f32 %v917_v53, %v915_v54  ;;  %v926_v18 = vmul.f32 %v1231_v13, %v925_v45 }
  0xcb   :  { %v1233_v50 = vpop.eup %1232 }
  0xcc   :  { %1236 = vtanh.f32 %v898_v63  ;;  %v921_v12 = vadd.f32 %v920_v49, %v918_v10  ;;  %v929_v43 = vmul.f32 %v1233_v50, %v928_v37 }
  0xcd   :  { %v1235_v42 = vpop.eup %1234 }
  0xce   :  { %v924_v39 = vadd.f32 %v923_v30, %v921_v12  ;;  %v932_v40 = vmul.f32 %v1235_v42, %v931_v29 }
  0xd0   :  { %v927_v58 = vadd.f32 %v926_v18, %v924_v39 }
  0xd2   :  { %v930_v16 = vadd.f32 %v929_v43, %v927_v58 }
  0xd4   :  { %v933_v21 = vadd.f32 %v932_v40, %v930_v16 }
  0xd6   :  { %v1237_v3 = vpop.eup %1236 }
  0xd7   :  { %v935_v56 = vmul.f32 %v1237_v3, %v934_v55 }
  0xd9   :  { %v936_v36 = vadd.f32 %v935_v56, %v933_v21 }
  0xdb   :  { %937 = vst [vmem:[#allocation7] sm:$0xff] %v936_v36 }
  0xdc   :  { %1281 = shalt.err (!%p1278_p1)
}
  0xdd   :  { %s1282_s28 = scalar_lea.hbm %s2791_s2, 128 }
  0xde   :  { %p1283_p2 = scmp.ne.s32.totalorder %s2791_s2, %s1282_s28  ;;  %p1286_p3 = scmp.lt.u32.totalorder %s1282_s28, %s2791_s2 }
  0xe0   :  { %p1288_p4 = pnand %p1286_p3, %p1283_p2 }
  0xe2   :  { %1291 = shalt.err (!%p1288_p4)
}
  0xe3   :  { %947 = dma.vmem_to_hbm [thread:$0]  %s945_s1, 128, %s2791_s2, [#allocation4]  }
  0xe4   :  { %1296 = dma.done.wait [#allocation4], 128  }
  0xe5   :  { %1297 = vsyncadd [#allocation4], 4294967168 }
  0xe6   :  { %951 = vsyncpa [#allocation3], 1 }
  0xe7   :  { %952 = vsyncpa [#allocation4], 1 }
  0xe8   :  { %953 = vsyncpa [#allocation5], 1 }

</bundles_post_ra>
